<compile_context>
chip_gen: v7x
topology: tpu7x:2x2x1
jax: 0.10.0
libtpu: 0.0.40
codegen_flags: <defaults>
</compile_context>

<pallas_src>
import math

import jax
import jax.numpy as jnp
from jax import lax
from jax.experimental import pallas as pl
from jax.experimental.pallas import tpu as pltpu


def _round_up(x, m):
    return (x + m - 1) // m * m


# ----------------------------------------------------------------------------
# Pallas kernel
# ----------------------------------------------------------------------------
def lstm_char_kernel(xproj_ref, mask_ref, whh_ref,
                     w1_ref, b1_ref, w2_ref, b2_ref, out_ref):
    # xproj_ref: (w, TN, 8H) precomputed input projections (+bias), lane-dense:
    #            cols [0:4H)   = emb[t]     @ wih_f + b_f   (fwd, step t)
    #            cols [4H:8H)  = emb[w-1-t] @ wih_r + b_r   (rev, step t)
    # mask_ref : (TN, 1) int32  per-word gather index (PyTorch char_mask)
    # whh_ref  : (2H, 8H)       block-diag [whh_f, 0; 0, whh_r]
    # out_ref  : (TN, A_pad)
    W_STEPS, TN, _G2 = xproj_ref.shape
    H = whh_ref.shape[0] // 2
    G = 4 * H

    mask = mask_ref[...]                         # (TN, 1) fwd gather index
    rev_mask = (W_STEPS - 1) - mask              # rev hidden at step t == output pos w-1-t
    whh_bd = whh_ref[...]                        # hoisted weight load (2H, 8H)

    zero = jnp.zeros((TN, H), jnp.float32)

    # One interleaved step: fwd direction at time t, rev direction at time
    # w-1-t (its xproj is already time-reversed).  Gate order (i, f, g, o).
    def step(t, carry):
        h_f, c_f, h_r, c_r, acc_f, acc_r = carry
        h_cat = jnp.concatenate([h_f, h_r], axis=-1)                 # (TN, 2H)
        gates = xproj_ref[t] + jnp.dot(
            h_cat, whh_bd, preferred_element_type=jnp.float32)       # (TN, 8H)

        i_f = jax.nn.sigmoid(gates[:, 0:H])
        f_f = jax.nn.sigmoid(gates[:, H:2 * H])
        g_f = jnp.tanh(gates[:, 2 * H:3 * H])
        o_f = jax.nn.sigmoid(gates[:, 3 * H:4 * H])
        i_r = jax.nn.sigmoid(gates[:, G:G + H])
        f_r = jax.nn.sigmoid(gates[:, G + H:G + 2 * H])
        g_r = jnp.tanh(gates[:, G + 2 * H:G + 3 * H])
        o_r = jax.nn.sigmoid(gates[:, G + 3 * H:G + 4 * H])

        c_f = f_f * c_f + i_f * g_f
        c_r = f_r * c_r + i_r * g_r
        h_f = o_f * jnp.tanh(c_f)
        h_r = o_r * jnp.tanh(c_r)

        # Fused gather: accumulate the hidden state only at the masked timestep.
        sel_f = (mask == t).astype(jnp.float32)
        sel_r = (rev_mask == t).astype(jnp.float32)
        acc_f = acc_f + sel_f * h_f
        acc_r = acc_r + sel_r * h_r
        return h_f, c_f, h_r, c_r, acc_f, acc_r

    carry = lax.fori_loop(0, W_STEPS, step,
                          (zero, zero, zero, zero, zero, zero),
                          unroll=True)
    acc_f, acc_r = carry[4], carry[5]
    gathered = jnp.concatenate([acc_f, acc_r], axis=-1)              # (TN, 2H)

    # MLP head: Linear(2H,128) -> ReLU -> [Dropout: identity in eval] -> Linear
    hid = jnp.maximum(
        jnp.dot(gathered, w1_ref[...], preferred_element_type=jnp.float32)
        + b1_ref[...], 0.0)
    out_ref[...] = (jnp.dot(hid, w2_ref[...], preferred_element_type=jnp.float32)
                    + b2_ref[...])


# ----------------------------------------------------------------------------
# Wrapper (glue: embedding lookup, input projection, padding, pallas_call)
# ----------------------------------------------------------------------------
def lstm_char_forward(x, char_mask, params, tile_n=256):
    b, s, w = x.shape
    N = b * s
    H = params["whh_f"].shape[0]
    A = params["w2"].shape[1]
    G = 4 * H

    # --- glue / precompute (plain XLA ops) ----------------------------------
    emb = jnp.take(params["embed"], x.reshape(N, w), axis=0)        # (N, w, E)

    # Input projections for both directions, fused with the time-major
    # transpose: output is directly (w, N, 4H), lane-dense (4H >= 128).
    xpf = jnp.einsum('nwe,eg->wng', emb, params["wih_f"]) + params["b_f"]
    xpr = jnp.einsum('nwe,eg->wng', emb[:, ::-1, :], params["wih_r"]) + params["b_r"]
    xproj = jnp.concatenate([xpf, xpr], axis=-1).astype(jnp.float32)  # (w, N, 8H)

    # Block-diagonal hidden->gates weights: one (2H,8H) MXU matmul per step
    # drives both directions.
    Z = jnp.zeros((H, G), jnp.float32)
    whh_bd = jnp.concatenate(
        [jnp.concatenate([params["whh_f"], Z], axis=1),
         jnp.concatenate([Z, params["whh_r"]], axis=1)], axis=0)      # (2H, 8H)

    # Lane-dense output: pad A up to a multiple of 128 with zero columns.
    A_pad = _round_up(A, 128)
    w2p = jnp.pad(params["w2"], ((0, 0), (0, A_pad - A)))
    b2p = jnp.pad(params["b2"], ((0, 0), (0, A_pad - A)))

    # Tile sizing: large tiles amortize per-grid-step overhead and fill MXU
    # rows; cap at the (8-rounded) problem size so tiny inputs aren't padded
    # to 256 rows.
    # TODO(synk): for v7x megacore, also cap tile_n at N/2 for large N so the
    # "parallel" grid axis has >= 2 steps to shard across the two TensorCores.
    tile_n = min(tile_n, _round_up(N, 8))
    N_pad = _round_up(N, tile_n)

    # NOTE: the fused gather assumes char_mask in [0, w) (as in the PyTorch
    # module); out-of-range / sentinel indices would yield zero vectors.
    mask = char_mask.reshape(N, 1).astype(jnp.int32)
    if N_pad != N:
        xproj = jnp.pad(xproj, ((0, 0), (0, N_pad - N), (0, 0)))
        mask = jnp.pad(mask, ((0, N_pad - N), (0, 0)))

    grid_spec = pltpu.PrefetchScalarGridSpec(
        num_scalar_prefetch=0,
        grid=(N_pad // tile_n,),
        in_specs=[
            pl.BlockSpec((w, tile_n, 2 * G), lambda n: (0, n, 0)),    # xproj
            pl.BlockSpec((tile_n, 1), lambda n: (n, 0)),              # mask
            pl.BlockSpec((2 * H, 2 * G), lambda n: (0, 0)),           # whh block-diag
            pl.BlockSpec((2 * H, 128), lambda n: (0, 0)),             # w1
            pl.BlockSpec((1, 128), lambda n: (0, 0)),                 # b1
            pl.BlockSpec((128, A_pad), lambda n: (0, 0)),             # w2 (padded)
            pl.BlockSpec((1, A_pad), lambda n: (0, 0)),               # b2 (padded)
        ],
        out_specs=pl.BlockSpec((tile_n, A_pad), lambda n: (n, 0)),
    )

    out = pl.pallas_call(
        lstm_char_kernel,
        out_shape=jax.ShapeDtypeStruct((N_pad, A_pad), jnp.float32),
        grid_spec=grid_spec,
        compiler_params=pltpu.CompilerParams(
            dimension_semantics=("parallel",)),
    )(xproj, mask, whh_bd,
      params["w1"], params["b1"], w2p, b2p)

    return out[:N, :A].reshape(b, s, A)


# ----------------------------------------------------------------------------
# Deterministic parameter init (shapes follow the PyTorch module __init__)
# ----------------------------------------------------------------------------
def init_params(key, vocab, E, H, A):
    ks = jax.random.split(key, 11)

    def u(k, shape, sc):
        return jax.random.uniform(k, shape, jnp.float32, -sc, sc)

    sl = 1.0 / math.sqrt(H)
    # NOTE: nn.init.uniform_ in the original overwrites the padding_idx row
    # too, so row 0 of the embedding is NOT forced to zero.
    return dict(
        embed=u(ks[0], (vocab, E), 0.25),
        # LSTM weights stored pre-transposed: (in, 4H) / (H, 4H); biases are
        # b_ih + b_hh folded into a single (1, 4H) row, gate order (i, f, g, o).
        wih_f=u(ks[1], (E, 4 * H), sl),
        whh_f=u(ks[2], (H, 4 * H), sl),
        b_f=u(ks[3], (1, 4 * H), sl),
        wih_r=u(ks[4], (E, 4 * H), sl),
        whh_r=u(ks[5], (H, 4 * H), sl),
        b_r=u(ks[6], (1, 4 * H), sl),
        w1=u(ks[7], (2 * H, 128), 1.0 / math.sqrt(2 * H)),
        b1=u(ks[8], (1, 128), 1.0 / math.sqrt(2 * H)),
        w2=u(ks[9], (128, A), 1.0 / math.sqrt(128)),
        b2=u(ks[10], (1, A), 1.0 / math.sqrt(128)),
    )


# ----------------------------------------------------------------------------
# Pure-JAX reference (mirrors the PyTorch forward) for a sanity check
# ----------------------------------------------------------------------------
def reference_forward(x, char_mask, params):
    b, s, w = x.shape
    N = b * s
    H = params["whh_f"].shape[0]
    emb = params["embed"][x].reshape(N, w, -1)            # (N, w, E)

    def run_dir(wih, whh, bias, reverse):
        seq = emb[:, ::-1, :] if reverse else emb

        def step(carry, x_t):
            h, c = carry
            gates = x_t @ wih + h @ whh + bias
            i = jax.nn.sigmoid(gates[:, :H])
            f = jax.nn.sigmoid(gates[:, H:2 * H])
            g = jnp.tanh(gates[:, 2 * H:3 * H])
            o = jax.nn.sigmoid(gates[:, 3 * H:])
            c = f * c + i * g
            h = o * jnp.tanh(c)
            return (h, c), h

        init = (jnp.zeros((N, H), jnp.float32), jnp.zeros((N, H), jnp.float32))
        _, hs = lax.scan(step, init, jnp.swapaxes(seq, 0, 1))
        hs = jnp.swapaxes(hs, 0, 1)                       # (N, w, H)
        return hs[:, ::-1, :] if reverse else hs

    h_f = run_dir(params["wih_f"], params["whh_f"], params["b_f"][0], False)
    h_r = run_dir(params["wih_r"], params["whh_r"], params["b_r"][0], True)
    out_lstm = jnp.concatenate([h_f, h_r], axis=-1)       # (N, w, 2H)
    idx = char_mask.reshape(N)
    gathered = out_lstm[jnp.arange(N), idx, :]            # (N, 2H)
    hid = jnp.maximum(gathered @ params["w1"] + params["b1"][0], 0.0)
    out = hid @ params["w2"] + params["b2"][0]
    return out.reshape(b, s, -1)


if __name__ == "__main__":
    B, S, W = 2, 8, 8                 # batch, seq (words), chars per word
    VOCAB, E, H, A = 32, 16, 32, 64   # char vocab, emb dim, lstm hidden, before_att_size

    key = jax.random.PRNGKey(0)
    kx, km, kp = jax.random.split(key, 3)
    x = jax.random.randint(kx, (B, S, W), 0, VOCAB, dtype=jnp.int32)
    char_mask = jax.random.randint(km, (B, S), 0, W, dtype=jnp.int32)
    params = init_params(kp, VOCAB, E, H, A)

    out = lstm_char_forward(x, char_mask, params)
    out = jax.block_until_ready(out)
    assert out.shape == (B, S, A)

    ref = reference_forward(x, char_mask, params)
    err = float(jnp.max(jnp.abs(out - ref)))
    assert err < 1e-2, f"mismatch vs reference: {err}"

    print("KERNEL_OK")
</pallas_src>

<mosaic_0001>
module attributes {stable_mosaic.version = 11 : i64} {
  func.func @lstm_char_kernel(%arg0: i32, %arg1: memref<8x16x256xf32, #tpu.memory_space<vmem>>, %arg2: memref<16x1xi32, #tpu.memory_space<vmem>>, %arg3: memref<64x256xf32, #tpu.memory_space<vmem>>, %arg4: memref<64x128xf32, #tpu.memory_space<vmem>>, %arg5: memref<1x128xf32, #tpu.memory_space<vmem>>, %arg6: memref<128x128xf32, #tpu.memory_space<vmem>>, %arg7: memref<1x128xf32, #tpu.memory_space<vmem>>, %arg8: memref<16x128xf32, #tpu.memory_space<vmem>>) attributes {dimension_semantics = [#tpu.dimension_semantics<parallel>], iteration_bounds = array<i64: 1>, scalar_prefetch = 0 : i64, scratch_operands = 0 : i64, tpu.core_type = #tpu.core_type<tc>, window_params = [{transform_indices = @transform_0, window_bounds = array<i64: 8, 16, 256>}, {transform_indices = @transform_1, window_bounds = array<i64: 16, 1>}, {pipeline_mode = #tpu.pipeline_mode<synchronous>, transform_indices = @transform_2, window_bounds = array<i64: 64, 256>}, {pipeline_mode = #tpu.pipeline_mode<synchronous>, transform_indices = @transform_3, window_bounds = array<i64: 64, 128>}, {pipeline_mode = #tpu.pipeline_mode<synchronous>, transform_indices = @transform_4, window_bounds = array<i64: 1, 128>}, {pipeline_mode = #tpu.pipeline_mode<synchronous>, transform_indices = @transform_5, window_bounds = array<i64: 128, 128>}, {pipeline_mode = #tpu.pipeline_mode<synchronous>, transform_indices = @transform_6, window_bounds = array<i64: 1, 128>}, {transform_indices = @transform_7, window_bounds = array<i64: 16, 128>}]} {
    %c0 = arith.constant 0 : index
    %c0_0 = arith.constant 0 : index
    %0 = vector.load %arg2[%c0, %c0_0] : memref<16x1xi32, #tpu.memory_space<vmem>>, vector<16x1xi32>
    %c7_i32 = arith.constant 7 : i32
    %1 = vector.broadcast %c7_i32 : i32 to vector<16x1xi32>
    %2 = arith.subi %1, %0 : vector<16x1xi32>
    %c0_1 = arith.constant 0 : index
    %c0_2 = arith.constant 0 : index
    %3 = vector.load %arg3[%c0_1, %c0_2] : memref<64x256xf32, #tpu.memory_space<vmem>>, vector<64x256xf32>
    %cst = arith.constant 0.000000e+00 : f32
    %4 = vector.broadcast %cst : f32 to vector<16x32xf32>
    %c0_i32 = arith.constant 0 : i32
    %5 = tpu.concatenate %4, %4 in 1 : vector<16x32xf32>, vector<16x32xf32> -> vector<16x64xf32>
    %6 = arith.index_cast %c0_i32 : i32 to index
    %c0_3 = arith.constant 0 : index
    %c0_4 = arith.constant 0 : index
    %7 = vector.load %arg1[%6, %c0_3, %c0_4] : memref<8x16x256xf32, #tpu.memory_space<vmem>>, vector<1x16x256xf32>
    %8 = vector.shape_cast %7 : vector<1x16x256xf32> to vector<16x256xf32>
    %cst_5 = arith.constant dense<0.000000e+00> : vector<16x256xf32>
    %9 = tpu.matmul %5, %3, %cst_5 {dimension_numbers = #tpu.dot_dimension_numbers<[1], [0], [0], [1], [0, 0, 1, 1], [], []>} : vector<16x64xf32>, vector<64x256xf32>, vector<16x256xf32> -> vector<16x256xf32>
    %10 = arith.addf %8, %9 : vector<16x256xf32>
    %11 = vector.extract_strided_slice %10 {offsets = [0, 0], sizes = [16, 32], strides = [1, 1]} : vector<16x256xf32> to vector<16x32xf32>
    %12 = arith.negf %11 : vector<16x32xf32>
    %13 = math.exp %12 : vector<16x32xf32>
    %cst_6 = arith.constant 1.000000e+00 : f32
    %14 = vector.broadcast %cst_6 : f32 to vector<16x32xf32>
    %15 = arith.addf %14, %13 : vector<16x32xf32>
    %16 = arith.divf %14, %15 : vector<16x32xf32>
    %17 = vector.extract_strided_slice %10 {offsets = [0, 32], sizes = [16, 32], strides = [1, 1]} : vector<16x256xf32> to vector<16x32xf32>
    %18 = arith.negf %17 : vector<16x32xf32>
    %19 = math.exp %18 : vector<16x32xf32>
    %cst_7 = arith.constant 1.000000e+00 : f32
    %20 = vector.broadcast %cst_7 : f32 to vector<16x32xf32>
    %21 = arith.addf %20, %19 : vector<16x32xf32>
    %22 = arith.divf %20, %21 : vector<16x32xf32>
    %23 = vector.extract_strided_slice %10 {offsets = [0, 64], sizes = [16, 32], strides = [1, 1]} : vector<16x256xf32> to vector<16x32xf32>
    %24 = math.tanh %23 : vector<16x32xf32>
    %25 = vector.extract_strided_slice %10 {offsets = [0, 96], sizes = [16, 32], strides = [1, 1]} : vector<16x256xf32> to vector<16x32xf32>
    %26 = arith.negf %25 : vector<16x32xf32>
    %27 = math.exp %26 : vector<16x32xf32>
    %cst_8 = arith.constant 1.000000e+00 : f32
    %28 = vector.broadcast %cst_8 : f32 to vector<16x32xf32>
    %29 = arith.addf %28, %27 : vector<16x32xf32>
    %30 = arith.divf %28, %29 : vector<16x32xf32>
    %31 = vector.extract_strided_slice %10 {offsets = [0, 128], sizes = [16, 32], strides = [1, 1]} : vector<16x256xf32> to vector<16x32xf32>
    %32 = arith.negf %31 : vector<16x32xf32>
    %33 = math.exp %32 : vector<16x32xf32>
    %cst_9 = arith.constant 1.000000e+00 : f32
    %34 = vector.broadcast %cst_9 : f32 to vector<16x32xf32>
    %35 = arith.addf %34, %33 : vector<16x32xf32>
    %36 = arith.divf %34, %35 : vector<16x32xf32>
    %37 = vector.extract_strided_slice %10 {offsets = [0, 160], sizes = [16, 32], strides = [1, 1]} : vector<16x256xf32> to vector<16x32xf32>
    %38 = arith.negf %37 : vector<16x32xf32>
    %39 = math.exp %38 : vector<16x32xf32>
    %cst_10 = arith.constant 1.000000e+00 : f32
    %40 = vector.broadcast %cst_10 : f32 to vector<16x32xf32>
    %41 = arith.addf %40, %39 : vector<16x32xf32>
    %42 = arith.divf %40, %41 : vector<16x32xf32>
    %43 = vector.extract_strided_slice %10 {offsets = [0, 192], sizes = [16, 32], strides = [1, 1]} : vector<16x256xf32> to vector<16x32xf32>
    %44 = math.tanh %43 : vector<16x32xf32>
    %45 = vector.extract_strided_slice %10 {offsets = [0, 224], sizes = [16, 32], strides = [1, 1]} : vector<16x256xf32> to vector<16x32xf32>
    %46 = arith.negf %45 : vector<16x32xf32>
    %47 = math.exp %46 : vector<16x32xf32>
    %cst_11 = arith.constant 1.000000e+00 : f32
    %48 = vector.broadcast %cst_11 : f32 to vector<16x32xf32>
    %49 = arith.addf %48, %47 : vector<16x32xf32>
    %50 = arith.divf %48, %49 : vector<16x32xf32>
    %51 = arith.mulf %22, %4 : vector<16x32xf32>
    %52 = arith.mulf %16, %24 : vector<16x32xf32>
    %53 = arith.addf %51, %52 : vector<16x32xf32>
    %54 = arith.mulf %42, %4 : vector<16x32xf32>
    %55 = arith.mulf %36, %44 : vector<16x32xf32>
    %56 = arith.addf %54, %55 : vector<16x32xf32>
    %57 = math.tanh %53 : vector<16x32xf32>
    %58 = arith.mulf %30, %57 : vector<16x32xf32>
    %59 = math.tanh %56 : vector<16x32xf32>
    %60 = arith.mulf %50, %59 : vector<16x32xf32>
    %61 = vector.broadcast %c0_i32 : i32 to vector<16x1xi32>
    %62 = arith.cmpi eq, %0, %61 : vector<16x1xi32>
    %63 = arith.extui %62 : vector<16x1xi1> to vector<16x1xi32>
    %64 = arith.sitofp %63 : vector<16x1xi32> to vector<16x1xf32>
    %65 = vector.broadcast %c0_i32 : i32 to vector<16x1xi32>
    %66 = arith.cmpi eq, %2, %65 : vector<16x1xi32>
    %67 = arith.extui %66 : vector<16x1xi1> to vector<16x1xi32>
    %68 = arith.sitofp %67 : vector<16x1xi32> to vector<16x1xf32>
    %69 = vector.broadcast %64 : vector<16x1xf32> to vector<16x32xf32>
    %70 = arith.mulf %69, %58 : vector<16x32xf32>
    %71 = arith.addf %4, %70 : vector<16x32xf32>
    %72 = vector.broadcast %68 : vector<16x1xf32> to vector<16x32xf32>
    %73 = arith.mulf %72, %60 : vector<16x32xf32>
    %74 = arith.addf %4, %73 : vector<16x32xf32>
    %c1_i32 = arith.constant 1 : i32
    %75 = tpu.concatenate %58, %60 in 1 : vector<16x32xf32>, vector<16x32xf32> -> vector<16x64xf32>
    %76 = arith.index_cast %c1_i32 : i32 to index
    %c0_12 = arith.constant 0 : index
    %c0_13 = arith.constant 0 : index
    %77 = vector.load %arg1[%76, %c0_12, %c0_13] : memref<8x16x256xf32, #tpu.memory_space<vmem>>, vector<1x16x256xf32>
    %78 = vector.shape_cast %77 : vector<1x16x256xf32> to vector<16x256xf32>
    %cst_14 = arith.constant dense<0.000000e+00> : vector<16x256xf32>
    %79 = tpu.matmul %75, %3, %cst_14 {dimension_numbers = #tpu.dot_dimension_numbers<[1], [0], [0], [1], [0, 0, 1, 1], [], []>} : vector<16x64xf32>, vector<64x256xf32>, vector<16x256xf32> -> vector<16x256xf32>
    %80 = arith.addf %78, %79 : vector<16x256xf32>
    %81 = vector.extract_strided_slice %80 {offsets = [0, 0], sizes = [16, 32], strides = [1, 1]} : vector<16x256xf32> to vector<16x32xf32>
    %82 = arith.negf %81 : vector<16x32xf32>
    %83 = math.exp %82 : vector<16x32xf32>
    %cst_15 = arith.constant 1.000000e+00 : f32
    %84 = vector.broadcast %cst_15 : f32 to vector<16x32xf32>
    %85 = arith.addf %84, %83 : vector<16x32xf32>
    %86 = arith.divf %84, %85 : vector<16x32xf32>
    %87 = vector.extract_strided_slice %80 {offsets = [0, 32], sizes = [16, 32], strides = [1, 1]} : vector<16x256xf32> to vector<16x32xf32>
    %88 = arith.negf %87 : vector<16x32xf32>
    %89 = math.exp %88 : vector<16x32xf32>
    %cst_16 = arith.constant 1.000000e+00 : f32
    %90 = vector.broadcast %cst_16 : f32 to vector<16x32xf32>
    %91 = arith.addf %90, %89 : vector<16x32xf32>
    %92 = arith.divf %90, %91 : vector<16x32xf32>
    %93 = vector.extract_strided_slice %80 {offsets = [0, 64], sizes = [16, 32], strides = [1, 1]} : vector<16x256xf32> to vector<16x32xf32>
    %94 = math.tanh %93 : vector<16x32xf32>
    %95 = vector.extract_strided_slice %80 {offsets = [0, 96], sizes = [16, 32], strides = [1, 1]} : vector<16x256xf32> to vector<16x32xf32>
    %96 = arith.negf %95 : vector<16x32xf32>
    %97 = math.exp %96 : vector<16x32xf32>
    %cst_17 = arith.constant 1.000000e+00 : f32
    %98 = vector.broadcast %cst_17 : f32 to vector<16x32xf32>
    %99 = arith.addf %98, %97 : vector<16x32xf32>
    %100 = arith.divf %98, %99 : vector<16x32xf32>
    %101 = vector.extract_strided_slice %80 {offsets = [0, 128], sizes = [16, 32], strides = [1, 1]} : vector<16x256xf32> to vector<16x32xf32>
    %102 = arith.negf %101 : vector<16x32xf32>
    %103 = math.exp %102 : vector<16x32xf32>
    %cst_18 = arith.constant 1.000000e+00 : f32
    %104 = vector.broadcast %cst_18 : f32 to vector<16x32xf32>
    %105 = arith.addf %104, %103 : vector<16x32xf32>
    %106 = arith.divf %104, %105 : vector<16x32xf32>
    %107 = vector.extract_strided_slice %80 {offsets = [0, 160], sizes = [16, 32], strides = [1, 1]} : vector<16x256xf32> to vector<16x32xf32>
    %108 = arith.negf %107 : vector<16x32xf32>
    %109 = math.exp %108 : vector<16x32xf32>
    %cst_19 = arith.constant 1.000000e+00 : f32
    %110 = vector.broadcast %cst_19 : f32 to vector<16x32xf32>
    %111 = arith.addf %110, %109 : vector<16x32xf32>
    %112 = arith.divf %110, %111 : vector<16x32xf32>
    %113 = vector.extract_strided_slice %80 {offsets = [0, 192], sizes = [16, 32], strides = [1, 1]} : vector<16x256xf32> to vector<16x32xf32>
    %114 = math.tanh %113 : vector<16x32xf32>
    %115 = vector.extract_strided_slice %80 {offsets = [0, 224], sizes = [16, 32], strides = [1, 1]} : vector<16x256xf32> to vector<16x32xf32>
    %116 = arith.negf %115 : vector<16x32xf32>
    %117 = math.exp %116 : vector<16x32xf32>
    %cst_20 = arith.constant 1.000000e+00 : f32
    %118 = vector.broadcast %cst_20 : f32 to vector<16x32xf32>
    %119 = arith.addf %118, %117 : vector<16x32xf32>
    %120 = arith.divf %118, %119 : vector<16x32xf32>
    %121 = arith.mulf %92, %53 : vector<16x32xf32>
    %122 = arith.mulf %86, %94 : vector<16x32xf32>
    %123 = arith.addf %121, %122 : vector<16x32xf32>
    %124 = arith.mulf %112, %56 : vector<16x32xf32>
    %125 = arith.mulf %106, %114 : vector<16x32xf32>
    %126 = arith.addf %124, %125 : vector<16x32xf32>
    %127 = math.tanh %123 : vector<16x32xf32>
    %128 = arith.mulf %100, %127 : vector<16x32xf32>
    %129 = math.tanh %126 : vector<16x32xf32>
    %130 = arith.mulf %120, %129 : vector<16x32xf32>
    %131 = vector.broadcast %c1_i32 : i32 to vector<16x1xi32>
    %132 = arith.cmpi eq, %0, %131 : vector<16x1xi32>
    %133 = arith.extui %132 : vector<16x1xi1> to vector<16x1xi32>
    %134 = arith.sitofp %133 : vector<16x1xi32> to vector<16x1xf32>
    %135 = vector.broadcast %c1_i32 : i32 to vector<16x1xi32>
    %136 = arith.cmpi eq, %2, %135 : vector<16x1xi32>
    %137 = arith.extui %136 : vector<16x1xi1> to vector<16x1xi32>
    %138 = arith.sitofp %137 : vector<16x1xi32> to vector<16x1xf32>
    %139 = vector.broadcast %134 : vector<16x1xf32> to vector<16x32xf32>
    %140 = arith.mulf %139, %128 : vector<16x32xf32>
    %141 = arith.addf %71, %140 : vector<16x32xf32>
    %142 = vector.broadcast %138 : vector<16x1xf32> to vector<16x32xf32>
    %143 = arith.mulf %142, %130 : vector<16x32xf32>
    %144 = arith.addf %74, %143 : vector<16x32xf32>
    %c2_i32 = arith.constant 2 : i32
    %145 = tpu.concatenate %128, %130 in 1 : vector<16x32xf32>, vector<16x32xf32> -> vector<16x64xf32>
    %146 = arith.index_cast %c2_i32 : i32 to index
    %c0_21 = arith.constant 0 : index
    %c0_22 = arith.constant 0 : index
    %147 = vector.load %arg1[%146, %c0_21, %c0_22] : memref<8x16x256xf32, #tpu.memory_space<vmem>>, vector<1x16x256xf32>
    %148 = vector.shape_cast %147 : vector<1x16x256xf32> to vector<16x256xf32>
    %cst_23 = arith.constant dense<0.000000e+00> : vector<16x256xf32>
    %149 = tpu.matmul %145, %3, %cst_23 {dimension_numbers = #tpu.dot_dimension_numbers<[1], [0], [0], [1], [0, 0, 1, 1], [], []>} : vector<16x64xf32>, vector<64x256xf32>, vector<16x256xf32> -> vector<16x256xf32>
    %150 = arith.addf %148, %149 : vector<16x256xf32>
    %151 = vector.extract_strided_slice %150 {offsets = [0, 0], sizes = [16, 32], strides = [1, 1]} : vector<16x256xf32> to vector<16x32xf32>
    %152 = arith.negf %151 : vector<16x32xf32>
    %153 = math.exp %152 : vector<16x32xf32>
    %cst_24 = arith.constant 1.000000e+00 : f32
    %154 = vector.broadcast %cst_24 : f32 to vector<16x32xf32>
    %155 = arith.addf %154, %153 : vector<16x32xf32>
    %156 = arith.divf %154, %155 : vector<16x32xf32>
    %157 = vector.extract_strided_slice %150 {offsets = [0, 32], sizes = [16, 32], strides = [1, 1]} : vector<16x256xf32> to vector<16x32xf32>
    %158 = arith.negf %157 : vector<16x32xf32>
    %159 = math.exp %158 : vector<16x32xf32>
    %cst_25 = arith.constant 1.000000e+00 : f32
    %160 = vector.broadcast %cst_25 : f32 to vector<16x32xf32>
    %161 = arith.addf %160, %159 : vector<16x32xf32>
    %162 = arith.divf %160, %161 : vector<16x32xf32>
    %163 = vector.extract_strided_slice %150 {offsets = [0, 64], sizes = [16, 32], strides = [1, 1]} : vector<16x256xf32> to vector<16x32xf32>
    %164 = math.tanh %163 : vector<16x32xf32>
    %165 = vector.extract_strided_slice %150 {offsets = [0, 96], sizes = [16, 32], strides = [1, 1]} : vector<16x256xf32> to vector<16x32xf32>
    %166 = arith.negf %165 : vector<16x32xf32>
    %167 = math.exp %166 : vector<16x32xf32>
    %cst_26 = arith.constant 1.000000e+00 : f32
    %168 = vector.broadcast %cst_26 : f32 to vector<16x32xf32>
    %169 = arith.addf %168, %167 : vector<16x32xf32>
    %170 = arith.divf %168, %169 : vector<16x32xf32>
    %171 = vector.extract_strided_slice %150 {offsets = [0, 128], sizes = [16, 32], strides = [1, 1]} : vector<16x256xf32> to vector<16x32xf32>
    %172 = arith.negf %171 : vector<16x32xf32>
    %173 = math.exp %172 : vector<16x32xf32>
    %cst_27 = arith.constant 1.000000e+00 : f32
    %174 = vector.broadcast %cst_27 : f32 to vector<16x32xf32>
    %175 = arith.addf %174, %173 : vector<16x32xf32>
    %176 = arith.divf %174, %175 : vector<16x32xf32>
    %177 = vector.extract_strided_slice %150 {offsets = [0, 160], sizes = [16, 32], strides = [1, 1]} : vector<16x256xf32> to vector<16x32xf32>
    %178 = arith.negf %177 : vector<16x32xf32>
    %179 = math.exp %178 : vector<16x32xf32>
    %cst_28 = arith.constant 1.000000e+00 : f32
    %180 = vector.broadcast %cst_28 : f32 to vector<16x32xf32>
    %181 = arith.addf %180, %179 : vector<16x32xf32>
    %182 = arith.divf %180, %181 : vector<16x32xf32>
    %183 = vector.extract_strided_slice %150 {offsets = [0, 192], sizes = [16, 32], strides = [1, 1]} : vector<16x256xf32> to vector<16x32xf32>
    %184 = math.tanh %183 : vector<16x32xf32>
    %185 = vector.extract_strided_slice %150 {offsets = [0, 224], sizes = [16, 32], strides = [1, 1]} : vector<16x256xf32> to vector<16x32xf32>
    %186 = arith.negf %185 : vector<16x32xf32>
    %187 = math.exp %186 : vector<16x32xf32>
    %cst_29 = arith.constant 1.000000e+00 : f32
    %188 = vector.broadcast %cst_29 : f32 to vector<16x32xf32>
    %189 = arith.addf %188, %187 : vector<16x32xf32>
    %190 = arith.divf %188, %189 : vector<16x32xf32>
    %191 = arith.mulf %162, %123 : vector<16x32xf32>
    %192 = arith.mulf %156, %164 : vector<16x32xf32>
    %193 = arith.addf %191, %192 : vector<16x32xf32>
    %194 = arith.mulf %182, %126 : vector<16x32xf32>
    %195 = arith.mulf %176, %184 : vector<16x32xf32>
    %196 = arith.addf %194, %195 : vector<16x32xf32>
    %197 = math.tanh %193 : vector<16x32xf32>
    %198 = arith.mulf %170, %197 : vector<16x32xf32>
    %199 = math.tanh %196 : vector<16x32xf32>
    %200 = arith.mulf %190, %199 : vector<16x32xf32>
    %201 = vector.broadcast %c2_i32 : i32 to vector<16x1xi32>
    %202 = arith.cmpi eq, %0, %201 : vector<16x1xi32>
    %203 = arith.extui %202 : vector<16x1xi1> to vector<16x1xi32>
    %204 = arith.sitofp %203 : vector<16x1xi32> to vector<16x1xf32>
    %205 = vector.broadcast %c2_i32 : i32 to vector<16x1xi32>
    %206 = arith.cmpi eq, %2, %205 : vector<16x1xi32>
    %207 = arith.extui %206 : vector<16x1xi1> to vector<16x1xi32>
    %208 = arith.sitofp %207 : vector<16x1xi32> to vector<16x1xf32>
    %209 = vector.broadcast %204 : vector<16x1xf32> to vector<16x32xf32>
    %210 = arith.mulf %209, %198 : vector<16x32xf32>
    %211 = arith.addf %141, %210 : vector<16x32xf32>
    %212 = vector.broadcast %208 : vector<16x1xf32> to vector<16x32xf32>
    %213 = arith.mulf %212, %200 : vector<16x32xf32>
    %214 = arith.addf %144, %213 : vector<16x32xf32>
    %c3_i32 = arith.constant 3 : i32
    %215 = tpu.concatenate %198, %200 in 1 : vector<16x32xf32>, vector<16x32xf32> -> vector<16x64xf32>
    %216 = arith.index_cast %c3_i32 : i32 to index
    %c0_30 = arith.constant 0 : index
    %c0_31 = arith.constant 0 : index
    %217 = vector.load %arg1[%216, %c0_30, %c0_31] : memref<8x16x256xf32, #tpu.memory_space<vmem>>, vector<1x16x256xf32>
    %218 = vector.shape_cast %217 : vector<1x16x256xf32> to vector<16x256xf32>
    %cst_32 = arith.constant dense<0.000000e+00> : vector<16x256xf32>
    %219 = tpu.matmul %215, %3, %cst_32 {dimension_numbers = #tpu.dot_dimension_numbers<[1], [0], [0], [1], [0, 0, 1, 1], [], []>} : vector<16x64xf32>, vector<64x256xf32>, vector<16x256xf32> -> vector<16x256xf32>
    %220 = arith.addf %218, %219 : vector<16x256xf32>
    %221 = vector.extract_strided_slice %220 {offsets = [0, 0], sizes = [16, 32], strides = [1, 1]} : vector<16x256xf32> to vector<16x32xf32>
    %222 = arith.negf %221 : vector<16x32xf32>
    %223 = math.exp %222 : vector<16x32xf32>
    %cst_33 = arith.constant 1.000000e+00 : f32
    %224 = vector.broadcast %cst_33 : f32 to vector<16x32xf32>
    %225 = arith.addf %224, %223 : vector<16x32xf32>
    %226 = arith.divf %224, %225 : vector<16x32xf32>
    %227 = vector.extract_strided_slice %220 {offsets = [0, 32], sizes = [16, 32], strides = [1, 1]} : vector<16x256xf32> to vector<16x32xf32>
    %228 = arith.negf %227 : vector<16x32xf32>
    %229 = math.exp %228 : vector<16x32xf32>
    %cst_34 = arith.constant 1.000000e+00 : f32
    %230 = vector.broadcast %cst_34 : f32 to vector<16x32xf32>
    %231 = arith.addf %230, %229 : vector<16x32xf32>
    %232 = arith.divf %230, %231 : vector<16x32xf32>
    %233 = vector.extract_strided_slice %220 {offsets = [0, 64], sizes = [16, 32], strides = [1, 1]} : vector<16x256xf32> to vector<16x32xf32>
    %234 = math.tanh %233 : vector<16x32xf32>
    %235 = vector.extract_strided_slice %220 {offsets = [0, 96], sizes = [16, 32], strides = [1, 1]} : vector<16x256xf32> to vector<16x32xf32>
    %236 = arith.negf %235 : vector<16x32xf32>
    %237 = math.exp %236 : vector<16x32xf32>
    %cst_35 = arith.constant 1.000000e+00 : f32
    %238 = vector.broadcast %cst_35 : f32 to vector<16x32xf32>
    %239 = arith.addf %238, %237 : vector<16x32xf32>
    %240 = arith.divf %238, %239 : vector<16x32xf32>
    %241 = vector.extract_strided_slice %220 {offsets = [0, 128], sizes = [16, 32], strides = [1, 1]} : vector<16x256xf32> to vector<16x32xf32>
    %242 = arith.negf %241 : vector<16x32xf32>
    %243 = math.exp %242 : vector<16x32xf32>
    %cst_36 = arith.constant 1.000000e+00 : f32
    %244 = vector.broadcast %cst_36 : f32 to vector<16x32xf32>
    %245 = arith.addf %244, %243 : vector<16x32xf32>
    %246 = arith.divf %244, %245 : vector<16x32xf32>
    %247 = vector.extract_strided_slice %220 {offsets = [0, 160], sizes = [16, 32], strides = [1, 1]} : vector<16x256xf32> to vector<16x32xf32>
    %248 = arith.negf %247 : vector<16x32xf32>
    %249 = math.exp %248 : vector<16x32xf32>
    %cst_37 = arith.constant 1.000000e+00 : f32
    %250 = vector.broadcast %cst_37 : f32 to vector<16x32xf32>
    %251 = arith.addf %250, %249 : vector<16x32xf32>
    %252 = arith.divf %250, %251 : vector<16x32xf32>
    %253 = vector.extract_strided_slice %220 {offsets = [0, 192], sizes = [16, 32], strides = [1, 1]} : vector<16x256xf32> to vector<16x32xf32>
    %254 = math.tanh %253 : vector<16x32xf32>
    %255 = vector.extract_strided_slice %220 {offsets = [0, 224], sizes = [16, 32], strides = [1, 1]} : vector<16x256xf32> to vector<16x32xf32>
    %256 = arith.negf %255 : vector<16x32xf32>
    %257 = math.exp %256 : vector<16x32xf32>
    %cst_38 = arith.constant 1.000000e+00 : f32
    %258 = vector.broadcast %cst_38 : f32 to vector<16x32xf32>
    %259 = arith.addf %258, %257 : vector<16x32xf32>
    %260 = arith.divf %258, %259 : vector<16x32xf32>
    %261 = arith.mulf %232, %193 : vector<16x32xf32>
    %262 = arith.mulf %226, %234 : vector<16x32xf32>
    %263 = arith.addf %261, %262 : vector<16x32xf32>
    %264 = arith.mulf %252, %196 : vector<16x32xf32>
    %265 = arith.mulf %246, %254 : vector<16x32xf32>
    %266 = arith.addf %264, %265 : vector<16x32xf32>
    %267 = math.tanh %263 : vector<16x32xf32>
    %268 = arith.mulf %240, %267 : vector<16x32xf32>
    %269 = math.tanh %266 : vector<16x32xf32>
    %270 = arith.mulf %260, %269 : vector<16x32xf32>
    %271 = vector.broadcast %c3_i32 : i32 to vector<16x1xi32>
    %272 = arith.cmpi eq, %0, %271 : vector<16x1xi32>
    %273 = arith.extui %272 : vector<16x1xi1> to vector<16x1xi32>
    %274 = arith.sitofp %273 : vector<16x1xi32> to vector<16x1xf32>
    %275 = vector.broadcast %c3_i32 : i32 to vector<16x1xi32>
    %276 = arith.cmpi eq, %2, %275 : vector<16x1xi32>
    %277 = arith.extui %276 : vector<16x1xi1> to vector<16x1xi32>
    %278 = arith.sitofp %277 : vector<16x1xi32> to vector<16x1xf32>
    %279 = vector.broadcast %274 : vector<16x1xf32> to vector<16x32xf32>
    %280 = arith.mulf %279, %268 : vector<16x32xf32>
    %281 = arith.addf %211, %280 : vector<16x32xf32>
    %282 = vector.broadcast %278 : vector<16x1xf32> to vector<16x32xf32>
    %283 = arith.mulf %282, %270 : vector<16x32xf32>
    %284 = arith.addf %214, %283 : vector<16x32xf32>
    %c4_i32 = arith.constant 4 : i32
    %285 = tpu.concatenate %268, %270 in 1 : vector<16x32xf32>, vector<16x32xf32> -> vector<16x64xf32>
    %286 = arith.index_cast %c4_i32 : i32 to index
    %c0_39 = arith.constant 0 : index
    %c0_40 = arith.constant 0 : index
    %287 = vector.load %arg1[%286, %c0_39, %c0_40] : memref<8x16x256xf32, #tpu.memory_space<vmem>>, vector<1x16x256xf32>
    %288 = vector.shape_cast %287 : vector<1x16x256xf32> to vector<16x256xf32>
    %cst_41 = arith.constant dense<0.000000e+00> : vector<16x256xf32>
    %289 = tpu.matmul %285, %3, %cst_41 {dimension_numbers = #tpu.dot_dimension_numbers<[1], [0], [0], [1], [0, 0, 1, 1], [], []>} : vector<16x64xf32>, vector<64x256xf32>, vector<16x256xf32> -> vector<16x256xf32>
    %290 = arith.addf %288, %289 : vector<16x256xf32>
    %291 = vector.extract_strided_slice %290 {offsets = [0, 0], sizes = [16, 32], strides = [1, 1]} : vector<16x256xf32> to vector<16x32xf32>
    %292 = arith.negf %291 : vector<16x32xf32>
    %293 = math.exp %292 : vector<16x32xf32>
    %cst_42 = arith.constant 1.000000e+00 : f32
    %294 = vector.broadcast %cst_42 : f32 to vector<16x32xf32>
    %295 = arith.addf %294, %293 : vector<16x32xf32>
    %296 = arith.divf %294, %295 : vector<16x32xf32>
    %297 = vector.extract_strided_slice %290 {offsets = [0, 32], sizes = [16, 32], strides = [1, 1]} : vector<16x256xf32> to vector<16x32xf32>
    %298 = arith.negf %297 : vector<16x32xf32>
    %299 = math.exp %298 : vector<16x32xf32>
    %cst_43 = arith.constant 1.000000e+00 : f32
    %300 = vector.broadcast %cst_43 : f32 to vector<16x32xf32>
    %301 = arith.addf %300, %299 : vector<16x32xf32>
    %302 = arith.divf %300, %301 : vector<16x32xf32>
    %303 = vector.extract_strided_slice %290 {offsets = [0, 64], sizes = [16, 32], strides = [1, 1]} : vector<16x256xf32> to vector<16x32xf32>
    %304 = math.tanh %303 : vector<16x32xf32>
    %305 = vector.extract_strided_slice %290 {offsets = [0, 96], sizes = [16, 32], strides = [1, 1]} : vector<16x256xf32> to vector<16x32xf32>
    %306 = arith.negf %305 : vector<16x32xf32>
    %307 = math.exp %306 : vector<16x32xf32>
    %cst_44 = arith.constant 1.000000e+00 : f32
    %308 = vector.broadcast %cst_44 : f32 to vector<16x32xf32>
    %309 = arith.addf %308, %307 : vector<16x32xf32>
    %310 = arith.divf %308, %309 : vector<16x32xf32>
    %311 = vector.extract_strided_slice %290 {offsets = [0, 128], sizes = [16, 32], strides = [1, 1]} : vector<16x256xf32> to vector<16x32xf32>
    %312 = arith.negf %311 : vector<16x32xf32>
    %313 = math.exp %312 : vector<16x32xf32>
    %cst_45 = arith.constant 1.000000e+00 : f32
    %314 = vector.broadcast %cst_45 : f32 to vector<16x32xf32>
    %315 = arith.addf %314, %313 : vector<16x32xf32>
    %316 = arith.divf %314, %315 : vector<16x32xf32>
    %317 = vector.extract_strided_slice %290 {offsets = [0, 160], sizes = [16, 32], strides = [1, 1]} : vector<16x256xf32> to vector<16x32xf32>
    %318 = arith.negf %317 : vector<16x32xf32>
    %319 = math.exp %318 : vector<16x32xf32>
    %cst_46 = arith.constant 1.000000e+00 : f32
    %320 = vector.broadcast %cst_46 : f32 to vector<16x32xf32>
    %321 = arith.addf %320, %319 : vector<16x32xf32>
    %322 = arith.divf %320, %321 : vector<16x32xf32>
    %323 = vector.extract_strided_slice %290 {offsets = [0, 192], sizes = [16, 32], strides = [1, 1]} : vector<16x256xf32> to vector<16x32xf32>
    %324 = math.tanh %323 : vector<16x32xf32>
    %325 = vector.extract_strided_slice %290 {offsets = [0, 224], sizes = [16, 32], strides = [1, 1]} : vector<16x256xf32> to vector<16x32xf32>
    %326 = arith.negf %325 : vector<16x32xf32>
    %327 = math.exp %326 : vector<16x32xf32>
    %cst_47 = arith.constant 1.000000e+00 : f32
    %328 = vector.broadcast %cst_47 : f32 to vector<16x32xf32>
    %329 = arith.addf %328, %327 : vector<16x32xf32>
    %330 = arith.divf %328, %329 : vector<16x32xf32>
    %331 = arith.mulf %302, %263 : vector<16x32xf32>
    %332 = arith.mulf %296, %304 : vector<16x32xf32>
    %333 = arith.addf %331, %332 : vector<16x32xf32>
    %334 = arith.mulf %322, %266 : vector<16x32xf32>
    %335 = arith.mulf %316, %324 : vector<16x32xf32>
    %336 = arith.addf %334, %335 : vector<16x32xf32>
    %337 = math.tanh %333 : vector<16x32xf32>
    %338 = arith.mulf %310, %337 : vector<16x32xf32>
    %339 = math.tanh %336 : vector<16x32xf32>
    %340 = arith.mulf %330, %339 : vector<16x32xf32>
    %341 = vector.broadcast %c4_i32 : i32 to vector<16x1xi32>
    %342 = arith.cmpi eq, %0, %341 : vector<16x1xi32>
    %343 = arith.extui %342 : vector<16x1xi1> to vector<16x1xi32>
    %344 = arith.sitofp %343 : vector<16x1xi32> to vector<16x1xf32>
    %345 = vector.broadcast %c4_i32 : i32 to vector<16x1xi32>
    %346 = arith.cmpi eq, %2, %345 : vector<16x1xi32>
    %347 = arith.extui %346 : vector<16x1xi1> to vector<16x1xi32>
    %348 = arith.sitofp %347 : vector<16x1xi32> to vector<16x1xf32>
    %349 = vector.broadcast %344 : vector<16x1xf32> to vector<16x32xf32>
    %350 = arith.mulf %349, %338 : vector<16x32xf32>
    %351 = arith.addf %281, %350 : vector<16x32xf32>
    %352 = vector.broadcast %348 : vector<16x1xf32> to vector<16x32xf32>
    %353 = arith.mulf %352, %340 : vector<16x32xf32>
    %354 = arith.addf %284, %353 : vector<16x32xf32>
    %c5_i32 = arith.constant 5 : i32
    %355 = tpu.concatenate %338, %340 in 1 : vector<16x32xf32>, vector<16x32xf32> -> vector<16x64xf32>
    %356 = arith.index_cast %c5_i32 : i32 to index
    %c0_48 = arith.constant 0 : index
    %c0_49 = arith.constant 0 : index
    %357 = vector.load %arg1[%356, %c0_48, %c0_49] : memref<8x16x256xf32, #tpu.memory_space<vmem>>, vector<1x16x256xf32>
    %358 = vector.shape_cast %357 : vector<1x16x256xf32> to vector<16x256xf32>
    %cst_50 = arith.constant dense<0.000000e+00> : vector<16x256xf32>
    %359 = tpu.matmul %355, %3, %cst_50 {dimension_numbers = #tpu.dot_dimension_numbers<[1], [0], [0], [1], [0, 0, 1, 1], [], []>} : vector<16x64xf32>, vector<64x256xf32>, vector<16x256xf32> -> vector<16x256xf32>
    %360 = arith.addf %358, %359 : vector<16x256xf32>
    %361 = vector.extract_strided_slice %360 {offsets = [0, 0], sizes = [16, 32], strides = [1, 1]} : vector<16x256xf32> to vector<16x32xf32>
    %362 = arith.negf %361 : vector<16x32xf32>
    %363 = math.exp %362 : vector<16x32xf32>
    %cst_51 = arith.constant 1.000000e+00 : f32
    %364 = vector.broadcast %cst_51 : f32 to vector<16x32xf32>
    %365 = arith.addf %364, %363 : vector<16x32xf32>
    %366 = arith.divf %364, %365 : vector<16x32xf32>
    %367 = vector.extract_strided_slice %360 {offsets = [0, 32], sizes = [16, 32], strides = [1, 1]} : vector<16x256xf32> to vector<16x32xf32>
    %368 = arith.negf %367 : vector<16x32xf32>
    %369 = math.exp %368 : vector<16x32xf32>
    %cst_52 = arith.constant 1.000000e+00 : f32
    %370 = vector.broadcast %cst_52 : f32 to vector<16x32xf32>
    %371 = arith.addf %370, %369 : vector<16x32xf32>
    %372 = arith.divf %370, %371 : vector<16x32xf32>
    %373 = vector.extract_strided_slice %360 {offsets = [0, 64], sizes = [16, 32], strides = [1, 1]} : vector<16x256xf32> to vector<16x32xf32>
    %374 = math.tanh %373 : vector<16x32xf32>
    %375 = vector.extract_strided_slice %360 {offsets = [0, 96], sizes = [16, 32], strides = [1, 1]} : vector<16x256xf32> to vector<16x32xf32>
    %376 = arith.negf %375 : vector<16x32xf32>
    %377 = math.exp %376 : vector<16x32xf32>
    %cst_53 = arith.constant 1.000000e+00 : f32
    %378 = vector.broadcast %cst_53 : f32 to vector<16x32xf32>
    %379 = arith.addf %378, %377 : vector<16x32xf32>
    %380 = arith.divf %378, %379 : vector<16x32xf32>
    %381 = vector.extract_strided_slice %360 {offsets = [0, 128], sizes = [16, 32], strides = [1, 1]} : vector<16x256xf32> to vector<16x32xf32>
    %382 = arith.negf %381 : vector<16x32xf32>
    %383 = math.exp %382 : vector<16x32xf32>
    %cst_54 = arith.constant 1.000000e+00 : f32
    %384 = vector.broadcast %cst_54 : f32 to vector<16x32xf32>
    %385 = arith.addf %384, %383 : vector<16x32xf32>
    %386 = arith.divf %384, %385 : vector<16x32xf32>
    %387 = vector.extract_strided_slice %360 {offsets = [0, 160], sizes = [16, 32], strides = [1, 1]} : vector<16x256xf32> to vector<16x32xf32>
    %388 = arith.negf %387 : vector<16x32xf32>
    %389 = math.exp %388 : vector<16x32xf32>
    %cst_55 = arith.constant 1.000000e+00 : f32
    %390 = vector.broadcast %cst_55 : f32 to vector<16x32xf32>
    %391 = arith.addf %390, %389 : vector<16x32xf32>
    %392 = arith.divf %390, %391 : vector<16x32xf32>
    %393 = vector.extract_strided_slice %360 {offsets = [0, 192], sizes = [16, 32], strides = [1, 1]} : vector<16x256xf32> to vector<16x32xf32>
    %394 = math.tanh %393 : vector<16x32xf32>
    %395 = vector.extract_strided_slice %360 {offsets = [0, 224], sizes = [16, 32], strides = [1, 1]} : vector<16x256xf32> to vector<16x32xf32>
    %396 = arith.negf %395 : vector<16x32xf32>
    %397 = math.exp %396 : vector<16x32xf32>
    %cst_56 = arith.constant 1.000000e+00 : f32
    %398 = vector.broadcast %cst_56 : f32 to vector<16x32xf32>
    %399 = arith.addf %398, %397 : vector<16x32xf32>
    %400 = arith.divf %398, %399 : vector<16x32xf32>
    %401 = arith.mulf %372, %333 : vector<16x32xf32>
    %402 = arith.mulf %366, %374 : vector<16x32xf32>
    %403 = arith.addf %401, %402 : vector<16x32xf32>
    %404 = arith.mulf %392, %336 : vector<16x32xf32>
    %405 = arith.mulf %386, %394 : vector<16x32xf32>
    %406 = arith.addf %404, %405 : vector<16x32xf32>
    %407 = math.tanh %403 : vector<16x32xf32>
    %408 = arith.mulf %380, %407 : vector<16x32xf32>
    %409 = math.tanh %406 : vector<16x32xf32>
    %410 = arith.mulf %400, %409 : vector<16x32xf32>
    %411 = vector.broadcast %c5_i32 : i32 to vector<16x1xi32>
    %412 = arith.cmpi eq, %0, %411 : vector<16x1xi32>
    %413 = arith.extui %412 : vector<16x1xi1> to vector<16x1xi32>
    %414 = arith.sitofp %413 : vector<16x1xi32> to vector<16x1xf32>
    %415 = vector.broadcast %c5_i32 : i32 to vector<16x1xi32>
    %416 = arith.cmpi eq, %2, %415 : vector<16x1xi32>
    %417 = arith.extui %416 : vector<16x1xi1> to vector<16x1xi32>
    %418 = arith.sitofp %417 : vector<16x1xi32> to vector<16x1xf32>
    %419 = vector.broadcast %414 : vector<16x1xf32> to vector<16x32xf32>
    %420 = arith.mulf %419, %408 : vector<16x32xf32>
    %421 = arith.addf %351, %420 : vector<16x32xf32>
    %422 = vector.broadcast %418 : vector<16x1xf32> to vector<16x32xf32>
    %423 = arith.mulf %422, %410 : vector<16x32xf32>
    %424 = arith.addf %354, %423 : vector<16x32xf32>
    %c6_i32 = arith.constant 6 : i32
    %425 = tpu.concatenate %408, %410 in 1 : vector<16x32xf32>, vector<16x32xf32> -> vector<16x64xf32>
    %426 = arith.index_cast %c6_i32 : i32 to index
    %c0_57 = arith.constant 0 : index
    %c0_58 = arith.constant 0 : index
    %427 = vector.load %arg1[%426, %c0_57, %c0_58] : memref<8x16x256xf32, #tpu.memory_space<vmem>>, vector<1x16x256xf32>
    %428 = vector.shape_cast %427 : vector<1x16x256xf32> to vector<16x256xf32>
    %cst_59 = arith.constant dense<0.000000e+00> : vector<16x256xf32>
    %429 = tpu.matmul %425, %3, %cst_59 {dimension_numbers = #tpu.dot_dimension_numbers<[1], [0], [0], [1], [0, 0, 1, 1], [], []>} : vector<16x64xf32>, vector<64x256xf32>, vector<16x256xf32> -> vector<16x256xf32>
    %430 = arith.addf %428, %429 : vector<16x256xf32>
    %431 = vector.extract_strided_slice %430 {offsets = [0, 0], sizes = [16, 32], strides = [1, 1]} : vector<16x256xf32> to vector<16x32xf32>
    %432 = arith.negf %431 : vector<16x32xf32>
    %433 = math.exp %432 : vector<16x32xf32>
    %cst_60 = arith.constant 1.000000e+00 : f32
    %434 = vector.broadcast %cst_60 : f32 to vector<16x32xf32>
    %435 = arith.addf %434, %433 : vector<16x32xf32>
    %436 = arith.divf %434, %435 : vector<16x32xf32>
    %437 = vector.extract_strided_slice %430 {offsets = [0, 32], sizes = [16, 32], strides = [1, 1]} : vector<16x256xf32> to vector<16x32xf32>
    %438 = arith.negf %437 : vector<16x32xf32>
    %439 = math.exp %438 : vector<16x32xf32>
    %cst_61 = arith.constant 1.000000e+00 : f32
    %440 = vector.broadcast %cst_61 : f32 to vector<16x32xf32>
    %441 = arith.addf %440, %439 : vector<16x32xf32>
    %442 = arith.divf %440, %441 : vector<16x32xf32>
    %443 = vector.extract_strided_slice %430 {offsets = [0, 64], sizes = [16, 32], strides = [1, 1]} : vector<16x256xf32> to vector<16x32xf32>
    %444 = math.tanh %443 : vector<16x32xf32>
    %445 = vector.extract_strided_slice %430 {offsets = [0, 96], sizes = [16, 32], strides = [1, 1]} : vector<16x256xf32> to vector<16x32xf32>
    %446 = arith.negf %445 : vector<16x32xf32>
    %447 = math.exp %446 : vector<16x32xf32>
    %cst_62 = arith.constant 1.000000e+00 : f32
    %448 = vector.broadcast %cst_62 : f32 to vector<16x32xf32>
    %449 = arith.addf %448, %447 : vector<16x32xf32>
    %450 = arith.divf %448, %449 : vector<16x32xf32>
    %451 = vector.extract_strided_slice %430 {offsets = [0, 128], sizes = [16, 32], strides = [1, 1]} : vector<16x256xf32> to vector<16x32xf32>
    %452 = arith.negf %451 : vector<16x32xf32>
    %453 = math.exp %452 : vector<16x32xf32>
    %cst_63 = arith.constant 1.000000e+00 : f32
    %454 = vector.broadcast %cst_63 : f32 to vector<16x32xf32>
    %455 = arith.addf %454, %453 : vector<16x32xf32>
    %456 = arith.divf %454, %455 : vector<16x32xf32>
    %457 = vector.extract_strided_slice %430 {offsets = [0, 160], sizes = [16, 32], strides = [1, 1]} : vector<16x256xf32> to vector<16x32xf32>
    %458 = arith.negf %457 : vector<16x32xf32>
    %459 = math.exp %458 : vector<16x32xf32>
    %cst_64 = arith.constant 1.000000e+00 : f32
    %460 = vector.broadcast %cst_64 : f32 to vector<16x32xf32>
    %461 = arith.addf %460, %459 : vector<16x32xf32>
    %462 = arith.divf %460, %461 : vector<16x32xf32>
    %463 = vector.extract_strided_slice %430 {offsets = [0, 192], sizes = [16, 32], strides = [1, 1]} : vector<16x256xf32> to vector<16x32xf32>
    %464 = math.tanh %463 : vector<16x32xf32>
    %465 = vector.extract_strided_slice %430 {offsets = [0, 224], sizes = [16, 32], strides = [1, 1]} : vector<16x256xf32> to vector<16x32xf32>
    %466 = arith.negf %465 : vector<16x32xf32>
    %467 = math.exp %466 : vector<16x32xf32>
    %cst_65 = arith.constant 1.000000e+00 : f32
    %468 = vector.broadcast %cst_65 : f32 to vector<16x32xf32>
    %469 = arith.addf %468, %467 : vector<16x32xf32>
    %470 = arith.divf %468, %469 : vector<16x32xf32>
    %471 = arith.mulf %442, %403 : vector<16x32xf32>
    %472 = arith.mulf %436, %444 : vector<16x32xf32>
    %473 = arith.addf %471, %472 : vector<16x32xf32>
    %474 = arith.mulf %462, %406 : vector<16x32xf32>
    %475 = arith.mulf %456, %464 : vector<16x32xf32>
    %476 = arith.addf %474, %475 : vector<16x32xf32>
    %477 = math.tanh %473 : vector<16x32xf32>
    %478 = arith.mulf %450, %477 : vector<16x32xf32>
    %479 = math.tanh %476 : vector<16x32xf32>
    %480 = arith.mulf %470, %479 : vector<16x32xf32>
    %481 = vector.broadcast %c6_i32 : i32 to vector<16x1xi32>
    %482 = arith.cmpi eq, %0, %481 : vector<16x1xi32>
    %483 = arith.extui %482 : vector<16x1xi1> to vector<16x1xi32>
    %484 = arith.sitofp %483 : vector<16x1xi32> to vector<16x1xf32>
    %485 = vector.broadcast %c6_i32 : i32 to vector<16x1xi32>
    %486 = arith.cmpi eq, %2, %485 : vector<16x1xi32>
    %487 = arith.extui %486 : vector<16x1xi1> to vector<16x1xi32>
    %488 = arith.sitofp %487 : vector<16x1xi32> to vector<16x1xf32>
    %489 = vector.broadcast %484 : vector<16x1xf32> to vector<16x32xf32>
    %490 = arith.mulf %489, %478 : vector<16x32xf32>
    %491 = arith.addf %421, %490 : vector<16x32xf32>
    %492 = vector.broadcast %488 : vector<16x1xf32> to vector<16x32xf32>
    %493 = arith.mulf %492, %480 : vector<16x32xf32>
    %494 = arith.addf %424, %493 : vector<16x32xf32>
    %c7_i32_66 = arith.constant 7 : i32
    %495 = tpu.concatenate %478, %480 in 1 : vector<16x32xf32>, vector<16x32xf32> -> vector<16x64xf32>
    %496 = arith.index_cast %c7_i32_66 : i32 to index
    %c0_67 = arith.constant 0 : index
    %c0_68 = arith.constant 0 : index
    %497 = vector.load %arg1[%496, %c0_67, %c0_68] : memref<8x16x256xf32, #tpu.memory_space<vmem>>, vector<1x16x256xf32>
    %498 = vector.shape_cast %497 : vector<1x16x256xf32> to vector<16x256xf32>
    %cst_69 = arith.constant dense<0.000000e+00> : vector<16x256xf32>
    %499 = tpu.matmul %495, %3, %cst_69 {dimension_numbers = #tpu.dot_dimension_numbers<[1], [0], [0], [1], [0, 0, 1, 1], [], []>} : vector<16x64xf32>, vector<64x256xf32>, vector<16x256xf32> -> vector<16x256xf32>
    %500 = arith.addf %498, %499 : vector<16x256xf32>
    %501 = vector.extract_strided_slice %500 {offsets = [0, 0], sizes = [16, 32], strides = [1, 1]} : vector<16x256xf32> to vector<16x32xf32>
    %502 = arith.negf %501 : vector<16x32xf32>
    %503 = math.exp %502 : vector<16x32xf32>
    %cst_70 = arith.constant 1.000000e+00 : f32
    %504 = vector.broadcast %cst_70 : f32 to vector<16x32xf32>
    %505 = arith.addf %504, %503 : vector<16x32xf32>
    %506 = arith.divf %504, %505 : vector<16x32xf32>
    %507 = vector.extract_strided_slice %500 {offsets = [0, 32], sizes = [16, 32], strides = [1, 1]} : vector<16x256xf32> to vector<16x32xf32>
    %508 = arith.negf %507 : vector<16x32xf32>
    %509 = math.exp %508 : vector<16x32xf32>
    %cst_71 = arith.constant 1.000000e+00 : f32
    %510 = vector.broadcast %cst_71 : f32 to vector<16x32xf32>
    %511 = arith.addf %510, %509 : vector<16x32xf32>
    %512 = arith.divf %510, %511 : vector<16x32xf32>
    %513 = vector.extract_strided_slice %500 {offsets = [0, 64], sizes = [16, 32], strides = [1, 1]} : vector<16x256xf32> to vector<16x32xf32>
    %514 = math.tanh %513 : vector<16x32xf32>
    %515 = vector.extract_strided_slice %500 {offsets = [0, 96], sizes = [16, 32], strides = [1, 1]} : vector<16x256xf32> to vector<16x32xf32>
    %516 = arith.negf %515 : vector<16x32xf32>
    %517 = math.exp %516 : vector<16x32xf32>
    %cst_72 = arith.constant 1.000000e+00 : f32
    %518 = vector.broadcast %cst_72 : f32 to vector<16x32xf32>
    %519 = arith.addf %518, %517 : vector<16x32xf32>
    %520 = arith.divf %518, %519 : vector<16x32xf32>
    %521 = vector.extract_strided_slice %500 {offsets = [0, 128], sizes = [16, 32], strides = [1, 1]} : vector<16x256xf32> to vector<16x32xf32>
    %522 = arith.negf %521 : vector<16x32xf32>
    %523 = math.exp %522 : vector<16x32xf32>
    %cst_73 = arith.constant 1.000000e+00 : f32
    %524 = vector.broadcast %cst_73 : f32 to vector<16x32xf32>
    %525 = arith.addf %524, %523 : vector<16x32xf32>
    %526 = arith.divf %524, %525 : vector<16x32xf32>
    %527 = vector.extract_strided_slice %500 {offsets = [0, 160], sizes = [16, 32], strides = [1, 1]} : vector<16x256xf32> to vector<16x32xf32>
    %528 = arith.negf %527 : vector<16x32xf32>
    %529 = math.exp %528 : vector<16x32xf32>
    %cst_74 = arith.constant 1.000000e+00 : f32
    %530 = vector.broadcast %cst_74 : f32 to vector<16x32xf32>
    %531 = arith.addf %530, %529 : vector<16x32xf32>
    %532 = arith.divf %530, %531 : vector<16x32xf32>
    %533 = vector.extract_strided_slice %500 {offsets = [0, 192], sizes = [16, 32], strides = [1, 1]} : vector<16x256xf32> to vector<16x32xf32>
    %534 = math.tanh %533 : vector<16x32xf32>
    %535 = vector.extract_strided_slice %500 {offsets = [0, 224], sizes = [16, 32], strides = [1, 1]} : vector<16x256xf32> to vector<16x32xf32>
    %536 = arith.negf %535 : vector<16x32xf32>
    %537 = math.exp %536 : vector<16x32xf32>
    %cst_75 = arith.constant 1.000000e+00 : f32
    %538 = vector.broadcast %cst_75 : f32 to vector<16x32xf32>
    %539 = arith.addf %538, %537 : vector<16x32xf32>
    %540 = arith.divf %538, %539 : vector<16x32xf32>
    %541 = arith.mulf %512, %473 : vector<16x32xf32>
    %542 = arith.mulf %506, %514 : vector<16x32xf32>
    %543 = arith.addf %541, %542 : vector<16x32xf32>
    %544 = arith.mulf %532, %476 : vector<16x32xf32>
    %545 = arith.mulf %526, %534 : vector<16x32xf32>
    %546 = arith.addf %544, %545 : vector<16x32xf32>
    %547 = math.tanh %543 : vector<16x32xf32>
    %548 = arith.mulf %520, %547 : vector<16x32xf32>
    %549 = math.tanh %546 : vector<16x32xf32>
    %550 = arith.mulf %540, %549 : vector<16x32xf32>
    %551 = vector.broadcast %c7_i32_66 : i32 to vector<16x1xi32>
    %552 = arith.cmpi eq, %0, %551 : vector<16x1xi32>
    %553 = arith.extui %552 : vector<16x1xi1> to vector<16x1xi32>
    %554 = arith.sitofp %553 : vector<16x1xi32> to vector<16x1xf32>
    %555 = vector.broadcast %c7_i32_66 : i32 to vector<16x1xi32>
    %556 = arith.cmpi eq, %2, %555 : vector<16x1xi32>
    %557 = arith.extui %556 : vector<16x1xi1> to vector<16x1xi32>
    %558 = arith.sitofp %557 : vector<16x1xi32> to vector<16x1xf32>
    %559 = vector.broadcast %554 : vector<16x1xf32> to vector<16x32xf32>
    %560 = arith.mulf %559, %548 : vector<16x32xf32>
    %561 = arith.addf %491, %560 : vector<16x32xf32>
    %562 = vector.broadcast %558 : vector<16x1xf32> to vector<16x32xf32>
    %563 = arith.mulf %562, %550 : vector<16x32xf32>
    %564 = arith.addf %494, %563 : vector<16x32xf32>
    %c8_i32 = arith.constant 8 : i32
    %565 = tpu.concatenate %561, %564 in 1 : vector<16x32xf32>, vector<16x32xf32> -> vector<16x64xf32>
    %c0_76 = arith.constant 0 : index
    %c0_77 = arith.constant 0 : index
    %566 = vector.load %arg4[%c0_76, %c0_77] : memref<64x128xf32, #tpu.memory_space<vmem>>, vector<64x128xf32>
    %cst_78 = arith.constant dense<0.000000e+00> : vector<16x128xf32>
    %567 = tpu.matmul %565, %566, %cst_78 {dimension_numbers = #tpu.dot_dimension_numbers<[1], [0], [0], [1], [0, 0, 1, 1], [], []>} : vector<16x64xf32>, vector<64x128xf32>, vector<16x128xf32> -> vector<16x128xf32>
    %c0_79 = arith.constant 0 : index
    %c0_80 = arith.constant 0 : index
    %568 = vector.load %arg5[%c0_79, %c0_80] : memref<1x128xf32, #tpu.memory_space<vmem>>, vector<1x128xf32>
    %569 = vector.broadcast %568 : vector<1x128xf32> to vector<16x128xf32>
    %570 = arith.addf %567, %569 : vector<16x128xf32>
    %cst_81 = arith.constant 0.000000e+00 : f32
    %571 = vector.broadcast %cst_81 : f32 to vector<16x128xf32>
    %572 = arith.maximumf %570, %571 : vector<16x128xf32>
    %c0_82 = arith.constant 0 : index
    %c0_83 = arith.constant 0 : index
    %573 = vector.load %arg6[%c0_82, %c0_83] : memref<128x128xf32, #tpu.memory_space<vmem>>, vector<128x128xf32>
    %cst_84 = arith.constant dense<0.000000e+00> : vector<16x128xf32>
    %574 = tpu.matmul %572, %573, %cst_84 {dimension_numbers = #tpu.dot_dimension_numbers<[1], [0], [0], [1], [0, 0, 1, 1], [], []>} : vector<16x128xf32>, vector<128x128xf32>, vector<16x128xf32> -> vector<16x128xf32>
    %c0_85 = arith.constant 0 : index
    %c0_86 = arith.constant 0 : index
    %575 = vector.load %arg7[%c0_85, %c0_86] : memref<1x128xf32, #tpu.memory_space<vmem>>, vector<1x128xf32>
    %576 = vector.broadcast %575 : vector<1x128xf32> to vector<16x128xf32>
    %577 = arith.addf %574, %576 : vector<16x128xf32>
    %c0_87 = arith.constant 0 : index
    %c0_88 = arith.constant 0 : index
    %578 = vector.load %arg8[%c0_87, %c0_88] : memref<16x128xf32, #tpu.memory_space<vmem>>, vector<16x128xf32>
    tpu.vector_store %arg8[%c0_87, %c0_88], %577 {strides = array<i32>} : memref<16x128xf32, #tpu.memory_space<vmem>>, vector<16x128xf32>,
    return
  }
  func.func @transform_0(%arg0: i32) -> (i32, i32, i32) {
    %c0_i32 = arith.constant 0 : i32
    %c0_i32_0 = arith.constant 0 : i32
    %c0_i32_1 = arith.constant 0 : i32
    return %c0_i32, %arg0, %c0_i32_0 : i32, i32, i32
  }
  func.func @transform_1(%arg0: i32) -> (i32, i32) {
    %c0_i32 = arith.constant 0 : i32
    %c0_i32_0 = arith.constant 0 : i32
    return %arg0, %c0_i32 : i32, i32
  }
  func.func @transform_2(%arg0: i32) -> (i32, i32) {
    %c0_i32 = arith.constant 0 : i32
    %c0_i32_0 = arith.constant 0 : i32
    %c0_i32_1 = arith.constant 0 : i32
    return %c0_i32, %c0_i32_0 : i32, i32
  }
  func.func @transform_3(%arg0: i32) -> (i32, i32) {
    %c0_i32 = arith.constant 0 : i32
    %c0_i32_0 = arith.constant 0 : i32
    %c0_i32_1 = arith.constant 0 : i32
    return %c0_i32, %c0_i32_0 : i32, i32
  }
  func.func @transform_4(%arg0: i32) -> (i32, i32) {
    %c0_i32 = arith.constant 0 : i32
    %c0_i32_0 = arith.constant 0 : i32
    %c0_i32_1 = arith.constant 0 : i32
    return %c0_i32, %c0_i32_0 : i32, i32
  }
  func.func @transform_5(%arg0: i32) -> (i32, i32) {
    %c0_i32 = arith.constant 0 : i32
    %c0_i32_0 = arith.constant 0 : i32
    %c0_i32_1 = arith.constant 0 : i32
    return %c0_i32, %c0_i32_0 : i32, i32
  }
  func.func @transform_6(%arg0: i32) -> (i32, i32) {
    %c0_i32 = arith.constant 0 : i32
    %c0_i32_0 = arith.constant 0 : i32
    %c0_i32_1 = arith.constant 0 : i32
    return %c0_i32, %c0_i32_0 : i32, i32
  }
  func.func @transform_7(%arg0: i32) -> (i32, i32) {
    %c0_i32 = arith.constant 0 : i32
    %c0_i32_0 = arith.constant 0 : i32
    return %arg0, %c0_i32 : i32, i32
  }
}

</mosaic_0001>

<bundles_post_ra>
// kernel: tpu_custom_call.1
= control target key start
LH: loop header
LB: loop body
LE: loop exit
PB: predicated region body
PF: predicated region fallthrough
CT: control target
= control target key end

     0   :  { %12 = vsyncpa [#allocation3], 0  ;;  %s3815_s0 = inlined_call_operand.hbm [shape: f32[8,16,256], index: 0, kind: input, shape index: {}]   ;;  %s3816_s1 = inlined_call_operand.vmem [shape: s32[16,1], index: 1, kind: input, shape index: {}]   ;;  %s3817_s2 = inlined_call_operand.hbm [shape: f32[64,256], index: 2, kind: input, shape index: {}]   ;;  %s3818_s3 = inlined_call_operand.hbm [shape: f32[64,128], index: 3, kind: input, shape index: {}]   ;;  %s3819_s4 = inlined_call_operand.vmem [shape: f32[1,128], index: 4, kind: input, shape index: {}]   ;;  %s3820_s5 = inlined_call_operand.hbm [shape: f32[128,128], index: 5, kind: input, shape index: {}]   ;;  %s3821_s6 = inlined_call_operand.vmem [shape: f32[1,128], index: 6, kind: input, shape index: {}]   ;;  %s3822_s7 = inlined_call_operand.hbm [shape: f32[16,128], index: 7, kind: output, shape index: {}]  }
   0x1   :  { %13 = vsyncpa [#allocation6], 0 }
   0x2   :  { %14 = vsyncpa [#allocation9], 0 }
   0x3   :  { %15 = vsyncpa [#allocation4], 0  ;;  %s3094_s24 = smov [#allocation5]   ;;  %s3095_s26 = smov [#allocation2]  }
   0x4   :  { %s35_s25 = sshll.u32 %s3094_s24, 4  ;;  %s21_s27 = sshll.u32 %s3095_s26, 4  ;;  %s36_s25 = int_to_ptr.vmem [resolvable:$true] %s35_s25  ;;  %s3147_s27 = int_to_ptr.vmem [resolvable:$true] %s21_s27 }
   0x5   :  { %s2976_s30 = scalar_lea.hbm %s3817_s2, 2048 }
   0x6   :  { %p2977_p0 = scmp.ne.s32.totalorder %s3817_s2, %s2976_s30  ;;  %p2980_p1 = scmp.lt.u32.totalorder %s2976_s30, %s3817_s2 }
   0x8   :  { %p2982_p2 = pnand %p2980_p1, %p2977_p0 }
   0xa   :  { %2985 = shalt.err (!%p2982_p2)
}
   0xb   :  { %s2986_s12 = scalar_lea.vmem %s36_s25, 2048  ;;  %p2991_p4 = scmp.lt.s32.totalorder %s36_s25, %s36_s25 }
   0xc   :  { %p2987_p3 = scmp.ne.s32.totalorder %s36_s25, %s2986_s12  ;;  %p2992_p5 = scmp.lt.s32.totalorder %s2986_s12, %s2986_s12 }
   0xe   :  { %p2993_p6 = por %p2992_p5, %p2991_p4 }
  0x10   :  { %p2994_p7 = pnand %p2993_p6, %p2987_p3 }
  0x12   :  { %2997 = shalt.err (!%p2994_p7)
}
  0x13   :  { %s3096_s13 = smov 256   ;;  %s3097_s14 = smov 16  }
  0x14   :  { %41 = dma.hbm_to_vmem [thread:$0]  %s3817_s2, 2048, %s36_s25, [#allocation6], %s3096_s13, %s3096_s13, %s3097_s14  }
  0x15   :  { %s2998_s19 = scalar_lea.hbm %s3815_s0, 4096 }
  0x16   :  { %p2999_p8 = scmp.ne.s32.totalorder %s3815_s0, %s2998_s19  ;;  %p3002_p9 = scmp.lt.u32.totalorder %s2998_s19, %s3815_s0 }
  0x18   :  { %p3004_p10 = pnand %p3002_p9, %p2999_p8 }
  0x1a   :  { %3007 = shalt.err (!%p3004_p10)
}
  0x1b   :  { %s3008_s24 = scalar_lea.vmem %s3147_s27, 4096  ;;  %p3013_p12 = scmp.lt.s32.totalorder %s3147_s27, %s3147_s27 }
  0x1c   :  { %p3009_p11 = scmp.ne.s32.totalorder %s3147_s27, %s3008_s24  ;;  %p3014_p13 = scmp.lt.s32.totalorder %s3008_s24, %s3008_s24 }
  0x1e   :  { %p3015_p0 = por %p3014_p13, %p3013_p12 }
  0x20   :  { %p3016_p1 = pnand %p3015_p0, %p3009_p11 }
  0x22   :  { %3019 = shalt.err (!%p3016_p1)
}
  0x23   :  { %27 = dma.hbm_to_vmem [thread:$0]  %s3815_s0, 4096, %s3147_s27, [#allocation3], %s3096_s13, %s3096_s13, %s3097_s14  }
  0x24   :  { %s3098_s26 = smov [#allocation7]   ;;  %s3020_s8 = scalar_lea.hbm %s3818_s3, 1024 }
  0x25   :  { %s47_s28 = sshll.u32 %s3098_s26, 4  ;;  %p3021_p2 = scmp.ne.s32.totalorder %s3818_s3, %s3020_s8  ;;  %s48_s28 = int_to_ptr.vmem [resolvable:$true] %s47_s28 }
  0x26   :  { %p3024_p3 = scmp.lt.u32.totalorder %s3020_s8, %s3818_s3 }
  0x28   :  { %p3026_p4 = pnand %p3024_p3, %p3021_p2 }
  0x2a   :  { %3029 = shalt.err (!%p3026_p4)
}
  0x2b   :  { %s3030_s15 = scalar_lea.vmem %s48_s28, 1024  ;;  %p3035_p6 = scmp.lt.s32.totalorder %s48_s28, %s48_s28 }
  0x2c   :  { %p3031_p5 = scmp.ne.s32.totalorder %s48_s28, %s3030_s15  ;;  %p3036_p7 = scmp.lt.s32.totalorder %s3030_s15, %s3030_s15 }
  0x2e   :  { %p3037_p8 = por %p3036_p7, %p3035_p6 }
  0x30   :  { %p3038_p9 = pnand %p3037_p8, %p3031_p5 }
  0x32   :  { %3041 = shalt.err (!%p3038_p9)
}
  0x33   :  { %s3099_s0 = smov 128   ;;  %s3100_s27 = smov 8  }
  0x34   :  { %53 = dma.hbm_to_vmem [thread:$0]  %s3818_s3, 1024, %s48_s28, [#allocation6], %s3099_s0, %s3099_s0, %s3100_s27  }
  0x35   :  { %s3101_s16 = smov [#allocation8]   ;;  %s3042_s20 = scalar_lea.hbm %s3820_s5, 2048 }
  0x36   :  { %s61_s17 = sshll.u32 %s3101_s16, 4  ;;  %p3043_p10 = scmp.ne.s32.totalorder %s3820_s5, %s3042_s20  ;;  %s62_s17 = int_to_ptr.vmem [resolvable:$true] %s61_s17 }
  0x37   :  { %p3046_p11 = scmp.lt.u32.totalorder %s3042_s20, %s3820_s5 }
  0x39   :  { %p3048_p12 = pnand %p3046_p11, %p3043_p10 }
  0x3b   :  { %3051 = shalt.err (!%p3048_p12)
}
  0x3c   :  { %s3052_s2 = scalar_lea.vmem %s62_s17, 2048  ;;  %p3057_p0 = scmp.lt.s32.totalorder %s62_s17, %s62_s17 }
  0x3d   :  { %p3053_p13 = scmp.ne.s32.totalorder %s62_s17, %s3052_s2  ;;  %p3058_p1 = scmp.lt.s32.totalorder %s3052_s2, %s3052_s2 }
  0x3f   :  { %p3059_p2 = por %p3058_p1, %p3057_p0 }
  0x41   :  { %p3060_p3 = pnand %p3059_p2, %p3053_p13 }
  0x43   :  { %3063 = shalt.err (!%p3060_p3)
}
  0x44   :  { %67 = dma.hbm_to_vmem [thread:$0]  %s3820_s5, 2048, %s62_s17, [#allocation9], %s3099_s0, %s3099_s0, %s3100_s27  }
  0x45   :  { %3086 = dma.done.wait [#allocation3], 4096  }
  0x46   :  { %3087 = vsyncadd [#allocation3], 4294963200 }
  0x47   :  { %3088 = dma.done.wait [#allocation6], 3072  }
  0x48   :  { %3089 = vsyncadd [#allocation6], 4294964224 }
  0x49   :  { %3090 = dma.done.wait [#allocation9], 2048  }
  0x4a   :  { %3091 = vsyncadd [#allocation9], 4294965248  ;;  %v3102_v0 = vmov 0.0   ;;  %v87_v1 = vld [vmem:[#allocation5 + $0x8] sm:$0xff]  ;;  %v89_v2 = vld [vmem:[#allocation5 + $0x18] sm:$0xff]  ;;  %s3103_s5 = smov 64  }
  0x4b   :  { %174 = vmatprep.mubr.f32.mxu0 %v3102_v0  ;;  %421 = vmatprep.mubr.f32.mxu1 %v3102_v0  ;;  %v86_v3 = vld [vmem:[#allocation5] sm:$0xff]  ;;  %v3210_v4 = vpack.c.bf16 %v89_v2, %v87_v1  ;;  %v88_v5 = vld [vmem:[#allocation5 + $0x10] sm:$0xff]  ;;  %v91_v6 = vld [vmem:[#allocation5 + $0x28] sm:$0xff]  ;;  %s3104_s26 = smov 32   ;;  %vm343_vm0 = vcmask 261120   ;;  %vm106_vm1 = vcmask 523264  }
  0x4c   :  { %v93_v7 = vld [vmem:[#allocation5 + $0x38] sm:$0xff]  ;;  %v3212_v8 = vpack.c.bf16 %v88_v5, %v86_v3  ;;  %v90_v10 = vld [vmem:[#allocation5 + $0x20] sm:$0xff]  ;;  %v92_v11 = vld [vmem:[#allocation5 + $0x30] sm:$0xff]  ;;  %s3106_s12 = smov [#allocation10]  }
  0x4d   :  { %v3214_v9 = vpack.c.bf16 %v93_v7, %v91_v6  ;;  %v95_v12 = vld [vmem:[#allocation5 + $0x48] sm:$0xff]  ;;  %2450 = vmatprep.subr.bf16.mxu0 %v3210_v4  ;;  %v97_v13 = vld [vmem:[#allocation5 + $0x58] sm:$0xff]  ;;  %2466 = vmatprep.subr.bf16.mxu1 %v3210_v4  ;;  %v3219_v14 = vpack.c.bf16 %v92_v11, %v90_v10  ;;  %v94_v16 = vld [vmem:[#allocation5 + $0x40] sm:$0xff]  ;;  %s2271_s15 = sshll.u32 %s3106_s12, 4  ;;  %s2272_s15 = int_to_ptr.vmem [resolvable:$true] %s2271_s15 }
  0x4e   :  { %2452 = vmatpush1.bf16.msra.mxu0 %v3212_v8  ;;  %2468 = vmatpush1.bf16.msra.mxu1 %v3212_v8  ;;  %v3223_v15 = vpack.c.bf16 %v97_v13, %v95_v12  ;;  %v96_v17 = vld [vmem:[#allocation5 + $0x50] sm:$0xff]  ;;  %v99_v18 = vld [vmem:[#allocation5 + $0x68] sm:$0xff]  ;;  %v101_v19 = vld [vmem:[#allocation5 + $0x78] sm:$0xff]  ;;  %p3069_p5 = scmp.lt.s32.totalorder %s2272_s15, %s2272_s15 }
  0x4f   :  { %2454 = vmatprep.subr.bf16.mxu0 %v3214_v9  ;;  %2470 = vmatprep.subr.bf16.mxu1 %v3214_v9  ;;  %v3227_v20 = vpack.c.bf16 %v96_v17, %v94_v16  ;;  %v3231_v21 = vpack.c.bf16 %v101_v19, %v99_v18  ;;  %v98_v22 = vld [vmem:[#allocation5 + $0x60] sm:$0xff]  ;;  %v100_v23 = vld [vmem:[#allocation5 + $0x70] sm:$0xff]  ;;  %v103_v26 = vld [vmem:[#allocation2 + $0x8] sm:$0xff] }
  0x50   :  { %v3235_v24 = vpack.c.bf16 %v100_v23, %v98_v22  ;;  %v102_v25 = vld [vmem:[#allocation2] sm:$0xff]  ;;  %v104_v31 = vld [vmem:[#allocation2 + $0x10] sm:$0xff]  ;;  %v105_v33 = vld [vmem:[#allocation2 + $0x18] sm:$0xff] }
  0x52   :  { %2456 = vmatpush1.bf16.msra.mxu0 %v3219_v14  ;;  %2472 = vmatpush1.bf16.msra.mxu1 %v3219_v14 }
  0x53   :  { %2458 = vmatprep.subr.bf16.mxu0 %v3223_v15  ;;  %2474 = vmatprep.subr.bf16.mxu1 %v3223_v15 }
  0x56   :  { %2460 = vmatpush1.bf16.msra.mxu0 %v3227_v20  ;;  %2476 = vmatpush1.bf16.msra.mxu1 %v3227_v20 }
  0x57   :  { %2462 = vmatprep.subr.bf16.mxu0 %v3231_v21  ;;  %2478 = vmatprep.subr.bf16.mxu1 %v3231_v21 }
  0x5a   :  { %2464 = vmatpush1.bf16.msra.mxu0 %v3235_v24  ;;  %2480 = vmatpush1.bf16.msra.mxu1 %v3235_v24 }
  0x5b   :  { %2482 = vmatprep.subr.bf16.mxu0 %v3210_v4  ;;  %2498 = vmatprep.subr.bf16.mxu1 %v3210_v4 }
  0x5d   :  { %175 = vmatmul.mubr.f32.vlgmr.msra.gmra.mrb[0].mxu0 %v3102_v0 }
  0x5e   :  { %180 = vmatprep.mubr.f32.mxu0 %v3102_v0  ;;  %2484 = vmatpush1.bf16.msra.mxu0 %v3212_v8 }
  0x5f   :  { %2486 = vmatprep.subr.bf16.mxu0 %v3214_v9 }
  0x61   :  { %181 = vmatmul.mubr.f32.gmra.mrb[2].mxu0 %v3102_v0 }
  0x62   :  { %2488 = vmatpush1.bf16.msra.mxu0 %v3219_v14  ;;  %667 = vmatprep.mubr.f32.mxu0 %v3102_v0 }
  0x63   :  { %2490 = vmatprep.subr.bf16.mxu0 %v3223_v15 }
  0x66   :  { %2492 = vmatpush1.bf16.msra.mxu0 %v3227_v20 }
  0x67   :  { %2494 = vmatprep.subr.bf16.mxu0 %v3231_v21 }
  0x6a   :  { %2496 = vmatpush1.bf16.msra.mxu0 %v3235_v24 }
  0x6b   :  { %2514 = vmatprep.subr.bf16.mxu0 %v3210_v4 }
 0x130   :  { %v176_v27 = vpop.f32.mrb[0].mxu0 }
 0x131   :  { %v187_v28 = vadd.f32 %v176_v27, %v102_v25  ;;  %v178_v29 = vpop.f32.mrb[1].mxu0 }
 0x132   :  { %v188_v30 = vadd.f32 %v178_v29, %v103_v26 }
 0x133   :  { %2720 = vtanh.f32 %v187_v28  ;;  %v2285_v41 = vmul.f32 -1.442695, %v187_v28 }
 0x134   :  { %v182_v32 = vpop.f32.mrb[2].mxu0  ;;  %2722 = vtanh.f32 %v188_v30  ;;  %v2287_v42 = vmul.f32 -1.442695, %v188_v30 }
 0x135   :  { %v189_v34 = vadd.f32 %v182_v32, %v104_v31  ;;  %v184_v35 = vpop.f32.mrb[3].mxu0 }
 0x136   :  { %v190_v36 = vadd.f32 %v184_v35, %v105_v33 }
 0x137   :  { %2724 = vtanh.f32 %v189_v34  ;;  %v2286_v43 = vmul.f32 -1.442695, %v189_v34 }
 0x138   :  { %2726 = vtanh.f32 %v190_v36  ;;  %v2288_v44 = vmul.f32 -1.442695, %v190_v36 }
 0x139   :  { %2728 = vpow2.f32 %v2285_v41  ;;  %v348_v41 = vld [vmem:[#allocation2 + $0x28] sm:$0xff] }
 0x13a   :  { %2730 = vpow2.f32 %v2287_v42 }
 0x13b   :  { %2732 = vpow2.f32 %v2286_v43 }
 0x13c   :  { %2734 = vpow2.f32 %v2288_v44 }
 0x13d   :  { %v2721_v37 = vpop.eup %2720 }
 0x13e   :  { %223 = vrot.lane.b32.xlu0 %v2721_v37, %s3103_s5  ;;  %v2723_v38 = vpop.eup %2722 }
 0x141   :  { %v2725_v39 = vpop.eup %2724 }
 0x142   :  { %245 = vrot.lane.b32.xlu0 %v2723_v38, %s3103_s5  ;;  %225 = vrot.lane.b32.xlu1 %v2725_v39, %s3103_s5  ;;  %v2727_v40 = vpop.eup %2726 }
 0x143   :  { %v2729_v45 = vpop.eup %2728 }
 0x144   :  { %v2731_v46 = vpop.eup %2730  ;;  %v197_v47 = vadd.f32 1.0, %v2729_v45 }
 0x145   :  { %v2733_v48 = vpop.eup %2732  ;;  %v211_v49 = vadd.f32 1.0, %v2731_v46  ;;  %v349_v46 = vld [vmem:[#allocation2 + $0x30] sm:$0xff] }
 0x146   :  { %247 = vrot.lane.b32.xlu1 %v2727_v40, %s3103_s5  ;;  %2736 = vrcp.f32 %v197_v47  ;;  %v198_v50 = vadd.f32 1.0, %v2733_v48  ;;  %v2735_v51 = vpop.eup %2734  ;;  %v347_v40 = vld [vmem:[#allocation2 + $0x20] sm:$0xff]  ;;  %v350_v47 = vld [vmem:[#allocation2 + $0x38] sm:$0xff] }
 0x147   :  { %2738 = vrcp.f32 %v211_v49  ;;  %v212_v52 = vadd.f32 1.0, %v2735_v51 }
 0x148   :  { %2740 = vrcp.f32 %v198_v50 }
 0x149   :  { %2742 = vrcp.f32 %v212_v52 }
 0x150   :  { %v2737_v53 = vpop.eup %2736 }
 0x151   :  { %v2739_v56 = vpop.eup %2738  ;;  %v219_v2 = vmul.f32 0.0, %v2737_v53 }
 0x152   :  { %v2741_v57 = vpop.eup %2740  ;;  %v241_v7 = vmul.f32 0.0, %v2739_v56 }
 0x153   :  { %v2743_v62 = vpop.eup %2742  ;;  %v220_v6 = vmul.f32 0.0, %v2741_v57 }
 0x154   :  { %v242_v16 = vmul.f32 0.0, %v2743_v62 }
 0x1b0   :  { %v224_v54 = vpop.permute.xlu0 %223 }
 0x1b1   :  { %v229_v55 = vmul.f32 %v2737_v53, %v224_v54 }
 0x1b3   :  { %233 = vrot.lane.b32.xlu0 %v229_v55, %s3104_s26 }
 0x1b4   :  { %v246_v58 = vpop.permute.xlu0 %245  ;;  %v226_v59 = vpop.permute.xlu1 %225 }
 0x1b5   :  { %v251_v60 = vmul.f32 %v2739_v56, %v246_v58  ;;  %v230_v61 = vmul.f32 %v2741_v57, %v226_v59 }
 0x1b7   :  { %235 = vrot.lane.b32.xlu0 %v230_v61, %s3104_s26  ;;  %255 = vrot.lane.b32.xlu1 %v251_v60, %s3104_s26 }
 0x1b8   :  { %v248_v63 = vpop.permute.xlu1 %247 }
 0x1b9   :  { %v252_v1 = vmul.f32 %v2743_v62, %v248_v63 }
 0x1bb   :  { %257 = vrot.lane.b32.xlu1 %v252_v1, %s3104_s26 }
 0x225   :  { %v234_v3 = vpop.permute.xlu0 %233 }
 0x226   :  { %v3264_v5 = vadd.f32 %v234_v3, %v219_v2 }
 0x228   :  { %2744 = vtanh.f32 %v3264_v5 }
 0x229   :  { %v236_v10 = vpop.permute.xlu0 %235  ;;  %v256_v11 = vpop.permute.xlu1 %255 }
 0x22a   :  { %v3267_v12 = vadd.f32 %v236_v10, %v220_v6  ;;  %v3269_v13 = vadd.f32 %v256_v11, %v241_v7 }
 0x22c   :  { %2746 = vtanh.f32 %v3267_v12 }
 0x22d   :  { %2748 = vtanh.f32 %v3269_v13  ;;  %v258_v17 = vpop.permute.xlu1 %257 }
 0x22e   :  { %v3273_v18 = vadd.f32 %v258_v17, %v242_v16 }
 0x230   :  { %2750 = vtanh.f32 %v3273_v18 }
 0x232   :  { %v2745_v19 = vpop.eup %2744 }
 0x233   :  { %267 = vrot.lane.b32.xlu0 %v2745_v19, %s3103_s5 }
 0x236   :  { %v2747_v22 = vpop.eup %2746 }
 0x237   :  { %v2749_v23 = vpop.eup %2748  ;;  %269 = vrot.lane.b32.xlu0 %v2747_v22, %s3103_s5 }
 0x238   :  { %279 = vrot.lane.b32.xlu1 %v2749_v23, %s3103_s5 }
 0x23a   :  { %v2751_v25 = vpop.eup %2750 }
 0x23c   :  { %281 = vrot.lane.b32.xlu1 %v2751_v25, %s3103_s5 }
 0x2a5   :  { %v268_v26 = vpop.permute.xlu0 %267 }
 0x2a6   :  { %v3280_v27 = vmul.f32 %v2737_v53, %v268_v26 }
 0x2a8   :  { %329 = vrot.lane.b32.xlu0 %v3280_v27, %s3104_s26 }
 0x2a9   :  { %v270_v28 = vpop.permute.xlu0 %269 }
 0x2aa   :  { %v3284_v29 = vmul.f32 %v2741_v57, %v270_v28  ;;  %v280_v30 = vpop.permute.xlu1 %279 }
 0x2ab   :  { %v3286_v31 = vmul.f32 %v2739_v56, %v280_v30 }
 0x2ac   :  { %331 = vrot.lane.b32.xlu0 %v3284_v29, %s3104_s26 }
 0x2ad   :  { %337 = vrot.lane.b32.xlu1 %v3286_v31, %s3103_s5 }
 0x2ae   :  { %v282_v32 = vpop.permute.xlu1 %281 }
 0x2af   :  { %v3292_v33 = vmul.f32 %v2743_v62, %v282_v32 }
 0x2b1   :  { %339 = vrot.lane.b32.xlu1 %v3292_v33, %s3103_s5 }
 0x31a   :  { %v330_v34 = vpop.permute.xlu0 %329 }
 0x31e   :  { %v332_v37 = vpop.permute.xlu0 %331 }
 0x31f   :  { %v338_v35 = vpop.permute.xlu1 %337 }
 0x320   :  { %v344_v36 = vsel %vm343_vm0, %v330_v34, %v338_v35 }
 0x321   :  { %2293 = vmatmul.mubr.msk.f32.vlgmr.msra.gmra.mrb[0].mxu1 %vm106_vm1, %v344_v36 }
 0x322   :  { %427 = vmatprep.mubr.f32.mxu1 %v3102_v0  ;;  %2500 = vmatpush1.bf16.msra.mxu1 %v3212_v8 }
 0x323   :  { %v340_v38 = vpop.permute.xlu1 %339  ;;  %2502 = vmatprep.subr.bf16.mxu1 %v3214_v9 }
 0x324   :  { %v345_v39 = vsel %vm343_vm0, %v332_v37, %v340_v38 }
 0x325   :  { %2294 = vmatmul.mubr.msk.f32.gmra.mrb[2].mxu1 %vm106_vm1, %v345_v39 }
 0x326   :  { %2504 = vmatpush1.bf16.msra.mxu1 %v3219_v14  ;;  %913 = vmatprep.mubr.f32.mxu1 %v3102_v0 }
 0x327   :  { %2506 = vmatprep.subr.bf16.mxu1 %v3223_v15 }
 0x32a   :  { %2508 = vmatpush1.bf16.msra.mxu1 %v3227_v20 }
 0x32b   :  { %2510 = vmatprep.subr.bf16.mxu1 %v3231_v21 }
 0x32e   :  { %2512 = vmatpush1.bf16.msra.mxu1 %v3235_v24 }
 0x32f   :  { %2530 = vmatprep.subr.bf16.mxu1 %v3210_v4 }
 0x3f4   :  { %v423_v42 = vpop.f32.mrb[0].mxu1 }
 0x3f5   :  { %v434_v43 = vadd.f32 %v423_v42, %v347_v40  ;;  %v425_v44 = vpop.f32.mrb[1].mxu1 }
 0x3f6   :  { %v435_v45 = vadd.f32 %v425_v44, %v348_v41 }
 0x3f7   :  { %2752 = vtanh.f32 %v434_v43  ;;  %v2295_v56 = vmul.f32 -1.442695, %v434_v43 }
 0x3f8   :  { %2754 = vtanh.f32 %v435_v45  ;;  %v429_v48 = vpop.f32.mrb[2].mxu1  ;;  %v2297_v57 = vmul.f32 -1.442695, %v435_v45 }
 0x3f9   :  { %v436_v49 = vadd.f32 %v429_v48, %v349_v46  ;;  %v431_v50 = vpop.f32.mrb[3].mxu1 }
 0x3fa   :  { %v437_v51 = vadd.f32 %v431_v50, %v350_v47 }
 0x3fb   :  { %2756 = vtanh.f32 %v436_v49  ;;  %v2296_v58 = vmul.f32 -1.442695, %v436_v49 }
 0x3fc   :  { %2758 = vtanh.f32 %v437_v51  ;;  %v2298_v59 = vmul.f32 -1.442695, %v437_v51 }
 0x3fd   :  { %2760 = vpow2.f32 %v2295_v56 }
 0x3fe   :  { %2762 = vpow2.f32 %v2297_v57 }
 0x3ff   :  { %2764 = vpow2.f32 %v2296_v58 }
 0x400   :  { %2766 = vpow2.f32 %v2298_v59  ;;  %v593_v59 = vld [vmem:[#allocation2 + $0x40] sm:$0xff] }
 0x401   :  { %v2753_v52 = vpop.eup %2752 }
 0x402   :  { %v2755_v53 = vpop.eup %2754  ;;  %470 = vrot.lane.b32.xlu0 %v2753_v52, %s3103_s5 }
 0x403   :  { %492 = vrot.lane.b32.xlu1 %v2755_v53, %s3103_s5 }
 0x405   :  { %v2757_v54 = vpop.eup %2756 }
 0x406   :  { %v2759_v55 = vpop.eup %2758  ;;  %472 = vrot.lane.b32.xlu0 %v2757_v54, %s3103_s5 }
 0x407   :  { %494 = vrot.lane.b32.xlu1 %v2759_v55, %s3103_s5  ;;  %v2761_v60 = vpop.eup %2760 }
 0x408   :  { %v2763_v61 = vpop.eup %2762  ;;  %v444_v62 = vadd.f32 1.0, %v2761_v60  ;;  %v594_v60 = vld [vmem:[#allocation2 + $0x48] sm:$0xff] }
 0x409   :  { %v2765_v63 = vpop.eup %2764  ;;  %v458_v1 = vadd.f32 1.0, %v2763_v61 }
 0x40a   :  { %v2767_v2 = vpop.eup %2766  ;;  %2768 = vrcp.f32 %v444_v62  ;;  %v445_v3 = vadd.f32 1.0, %v2765_v63 }
 0x40b   :  { %2770 = vrcp.f32 %v458_v1  ;;  %v459_v6 = vadd.f32 1.0, %v2767_v2  ;;  %v595_v2 = vld [vmem:[#allocation2 + $0x50] sm:$0xff] }
 0x40c   :  { %2772 = vrcp.f32 %v445_v3  ;;  %v596_v3 = vld [vmem:[#allocation2 + $0x58] sm:$0xff] }
 0x40d   :  { %2774 = vrcp.f32 %v459_v6 }
 0x414   :  { %v2769_v7 = vpop.eup %2768 }
 0x415   :  { %v2771_v11 = vpop.eup %2770  ;;  %v466_v32 = vmul.f32 %v2769_v7, %v3264_v5 }
 0x416   :  { %v2773_v22 = vpop.eup %2772  ;;  %v488_v35 = vmul.f32 %v2771_v11, %v3269_v13 }
 0x417   :  { %v2775_v25 = vpop.eup %2774  ;;  %v467_v39 = vmul.f32 %v2773_v22, %v3267_v12 }
 0x418   :  { %v489_v41 = vmul.f32 %v2775_v25, %v3273_v18 }
 0x474   :  { %v471_v10 = vpop.permute.xlu0 %470 }
 0x475   :  { %v476_v16 = vmul.f32 %v2769_v7, %v471_v10  ;;  %v493_v17 = vpop.permute.xlu1 %492 }
 0x476   :  { %v498_v19 = vmul.f32 %v2771_v11, %v493_v17 }
 0x477   :  { %480 = vrot.lane.b32.xlu0 %v476_v16, %s3104_s26 }
 0x478   :  { %v473_v23 = vpop.permute.xlu0 %472  ;;  %502 = vrot.lane.b32.xlu1 %v498_v19, %s3104_s26 }
 0x479   :  { %v477_v26 = vmul.f32 %v2773_v22, %v473_v23  ;;  %v495_v28 = vpop.permute.xlu1 %494 }
 0x47a   :  { %v499_v30 = vmul.f32 %v2775_v25, %v495_v28 }
 0x47b   :  { %482 = vrot.lane.b32.xlu0 %v477_v26, %s3104_s26 }
 0x47c   :  { %504 = vrot.lane.b32.xlu1 %v499_v30, %s3104_s26 }
 0x4e9   :  { %v481_v34 = vpop.permute.xlu0 %480 }
 0x4ea   :  { %v3320_v36 = vadd.f32 %v481_v34, %v466_v32  ;;  %v503_v37 = vpop.permute.xlu1 %502 }
 0x4eb   :  { %v3322_v38 = vadd.f32 %v503_v37, %v488_v35 }
 0x4ec   :  { %2776 = vtanh.f32 %v3320_v36 }
 0x4ed   :  { %2778 = vtanh.f32 %v3322_v38  ;;  %v483_v40 = vpop.permute.xlu0 %482 }
 0x4ee   :  { %v3328_v42 = vadd.f32 %v483_v40, %v467_v39  ;;  %v505_v5 = vpop.permute.xlu1 %504 }
 0x4ef   :  { %v3330_v43 = vadd.f32 %v505_v5, %v489_v41 }
 0x4f0   :  { %2780 = vtanh.f32 %v3328_v42 }
 0x4f1   :  { %2782 = vtanh.f32 %v3330_v43 }
 0x4f6   :  { %v2777_v13 = vpop.eup %2776 }
 0x4f7   :  { %v2779_v44 = vpop.eup %2778  ;;  %514 = vrot.lane.b32.xlu0 %v2777_v13, %s3103_s5 }
 0x4f8   :  { %526 = vrot.lane.b32.xlu1 %v2779_v44, %s3103_s5 }
 0x4fa   :  { %v2781_v12 = vpop.eup %2780 }
 0x4fb   :  { %v2783_v45 = vpop.eup %2782  ;;  %516 = vrot.lane.b32.xlu0 %v2781_v12, %s3103_s5 }
 0x4fc   :  { %528 = vrot.lane.b32.xlu1 %v2783_v45, %s3103_s5 }
 0x569   :  { %v515_v18 = vpop.permute.xlu0 %514 }
 0x56a   :  { %v3338_v46 = vmul.f32 %v2769_v7, %v515_v18  ;;  %v527_v47 = vpop.permute.xlu1 %526 }
 0x56b   :  { %v3340_v48 = vmul.f32 %v2771_v11, %v527_v47 }
 0x56c   :  { %576 = vrot.lane.b32.xlu0 %v3338_v46, %s3104_s26 }
 0x56d   :  { %v517_v49 = vpop.permute.xlu0 %516  ;;  %584 = vrot.lane.b32.xlu1 %v3340_v48, %s3103_s5 }
 0x56e   :  { %v3346_v50 = vmul.f32 %v2773_v22, %v517_v49  ;;  %v529_v51 = vpop.permute.xlu1 %528 }
 0x56f   :  { %v3348_v52 = vmul.f32 %v2775_v25, %v529_v51 }
 0x570   :  { %578 = vrot.lane.b32.xlu0 %v3346_v50, %s3104_s26 }
 0x571   :  { %586 = vrot.lane.b32.xlu1 %v3348_v52, %s3103_s5 }
 0x5de   :  { %v577_v53 = vpop.permute.xlu0 %576 }
 0x5df   :  { %v585_v54 = vpop.permute.xlu1 %584 }
 0x5e0   :  { %v590_v55 = vsel %vm343_vm0, %v577_v53, %v585_v54 }
 0x5e1   :  { %2303 = vmatmul.mubr.msk.f32.vlgmr.msra.gmra.mrb[4].mxu0 %vm106_vm1, %v590_v55 }
 0x5e2   :  { %v579_v56 = vpop.permute.xlu0 %578  ;;  %673 = vmatprep.mubr.f32.mxu0 %v3102_v0  ;;  %2516 = vmatpush1.bf16.msra.mxu0 %v3212_v8 }
 0x5e3   :  { %v587_v57 = vpop.permute.xlu1 %586  ;;  %2518 = vmatprep.subr.bf16.mxu0 %v3214_v9 }
 0x5e4   :  { %v591_v58 = vsel %vm343_vm0, %v579_v56, %v587_v57 }
 0x5e5   :  { %2304 = vmatmul.mubr.msk.f32.gmra.mrb[6].mxu0 %vm106_vm1, %v591_v58 }
 0x5e6   :  { %2520 = vmatpush1.bf16.msra.mxu0 %v3219_v14  ;;  %1159 = vmatprep.mubr.f32.mxu0 %v3102_v0 }
 0x5e7   :  { %2522 = vmatprep.subr.bf16.mxu0 %v3223_v15 }
 0x5ea   :  { %2524 = vmatpush1.bf16.msra.mxu0 %v3227_v20 }
 0x5eb   :  { %2526 = vmatprep.subr.bf16.mxu0 %v3231_v21 }
 0x5ee   :  { %2528 = vmatpush1.bf16.msra.mxu0 %v3235_v24 }
 0x5ef   :  { %2546 = vmatprep.subr.bf16.mxu0 %v3210_v4 }
 0x6b4   :  { %v669_v61 = vpop.f32.mrb[4].mxu0 }
 0x6b5   :  { %v680_v62 = vadd.f32 %v669_v61, %v593_v59  ;;  %v671_v63 = vpop.f32.mrb[5].mxu0 }
 0x6b6   :  { %v681_v1 = vadd.f32 %v671_v63, %v594_v60 }
 0x6b7   :  { %2784 = vtanh.f32 %v680_v62  ;;  %v2305_v23 = vmul.f32 -1.442695, %v680_v62 }
 0x6b8   :  { %2786 = vtanh.f32 %v681_v1  ;;  %v675_v6 = vpop.f32.mrb[6].mxu0  ;;  %v2307_v25 = vmul.f32 -1.442695, %v681_v1 }
 0x6b9   :  { %v682_v7 = vadd.f32 %v675_v6, %v595_v2  ;;  %v677_v10 = vpop.f32.mrb[7].mxu0 }
 0x6ba   :  { %v683_v11 = vadd.f32 %v677_v10, %v596_v3 }
 0x6bb   :  { %2788 = vtanh.f32 %v682_v7  ;;  %v2306_v26 = vmul.f32 -1.442695, %v682_v7 }
 0x6bc   :  { %2790 = vtanh.f32 %v683_v11  ;;  %v2308_v28 = vmul.f32 -1.442695, %v683_v11 }
 0x6bd   :  { %2792 = vpow2.f32 %v2305_v23 }
 0x6be   :  { %2794 = vpow2.f32 %v2307_v25 }
 0x6bf   :  { %2796 = vpow2.f32 %v2306_v26 }
 0x6c0   :  { %2798 = vpow2.f32 %v2308_v28 }
 0x6c1   :  { %v2785_v16 = vpop.eup %2784 }
 0x6c2   :  { %v2787_v17 = vpop.eup %2786  ;;  %716 = vrot.lane.b32.xlu0 %v2785_v16, %s3103_s5 }
 0x6c3   :  { %738 = vrot.lane.b32.xlu1 %v2787_v17, %s3103_s5 }
 0x6c5   :  { %v2789_v19 = vpop.eup %2788 }
 0x6c6   :  { %v2791_v22 = vpop.eup %2790  ;;  %718 = vrot.lane.b32.xlu0 %v2789_v19, %s3103_s5 }
 0x6c7   :  { %740 = vrot.lane.b32.xlu1 %v2791_v22, %s3103_s5  ;;  %v2793_v30 = vpop.eup %2792 }
 0x6c8   :  { %v2795_v32 = vpop.eup %2794  ;;  %v690_v34 = vadd.f32 1.0, %v2793_v30 }
 0x6c9   :  { %v2797_v35 = vpop.eup %2796  ;;  %v704_v37 = vadd.f32 1.0, %v2795_v32 }
 0x6ca   :  { %v2799_v39 = vpop.eup %2798  ;;  %2800 = vrcp.f32 %v690_v34  ;;  %v691_v40 = vadd.f32 1.0, %v2797_v35  ;;  %v839_v35 = vld [vmem:[#allocation2 + $0x60] sm:$0xff] }
 0x6cb   :  { %2802 = vrcp.f32 %v704_v37  ;;  %v705_v41 = vadd.f32 1.0, %v2799_v39  ;;  %v840_v37 = vld [vmem:[#allocation2 + $0x68] sm:$0xff] }
 0x6cc   :  { %2804 = vrcp.f32 %v691_v40 }
 0x6cd   :  { %2806 = vrcp.f32 %v705_v41 }
 0x6d4   :  { %v2801_v5 = vpop.eup %2800 }
 0x6d5   :  { %v2803_v44 = vpop.eup %2802  ;;  %v712_v56 = vmul.f32 %v2801_v5, %v3320_v36 }
 0x6d6   :  { %v2805_v47 = vpop.eup %2804  ;;  %v734_v58 = vmul.f32 %v2803_v44, %v3322_v38 }
 0x6d7   :  { %v2807_v51 = vpop.eup %2806  ;;  %v713_v62 = vmul.f32 %v2805_v47, %v3328_v42 }
 0x6d8   :  { %v735_v1 = vmul.f32 %v2807_v51, %v3330_v43 }
 0x734   :  { %v717_v13 = vpop.permute.xlu0 %716 }
 0x735   :  { %v722_v12 = vmul.f32 %v2801_v5, %v717_v13  ;;  %v739_v45 = vpop.permute.xlu1 %738  ;;  %v841_v13 = vld [vmem:[#allocation2 + $0x70] sm:$0xff] }
 0x736   :  { %v744_v18 = vmul.f32 %v2803_v44, %v739_v45 }
 0x737   :  { %726 = vrot.lane.b32.xlu0 %v722_v12, %s3104_s26 }
 0x738   :  { %v719_v49 = vpop.permute.xlu0 %718  ;;  %748 = vrot.lane.b32.xlu1 %v744_v18, %s3104_s26 }
 0x739   :  { %v723_v53 = vmul.f32 %v2805_v47, %v719_v49  ;;  %v741_v54 = vpop.permute.xlu1 %740 }
 0x73a   :  { %v745_v55 = vmul.f32 %v2807_v51, %v741_v54 }
 0x73b   :  { %728 = vrot.lane.b32.xlu0 %v723_v53, %s3104_s26 }
 0x73c   :  { %750 = vrot.lane.b32.xlu1 %v745_v55, %s3104_s26 }
 0x7a9   :  { %v727_v57 = vpop.permute.xlu0 %726 }
 0x7aa   :  { %v3378_v59 = vadd.f32 %v727_v57, %v712_v56  ;;  %v749_v60 = vpop.permute.xlu1 %748 }
 0x7ab   :  { %v3380_v61 = vadd.f32 %v749_v60, %v734_v58 }
 0x7ac   :  { %2808 = vtanh.f32 %v3378_v59 }
 0x7ad   :  { %2810 = vtanh.f32 %v3380_v61  ;;  %v729_v63 = vpop.permute.xlu0 %728 }
 0x7ae   :  { %v3386_v2 = vadd.f32 %v729_v63, %v713_v62  ;;  %v751_v36 = vpop.permute.xlu1 %750 }
 0x7af   :  { %v3388_v3 = vadd.f32 %v751_v36, %v735_v1 }
 0x7b0   :  { %2812 = vtanh.f32 %v3386_v2 }
 0x7b1   :  { %2814 = vtanh.f32 %v3388_v3 }
 0x7b6   :  { %v2809_v38 = vpop.eup %2808 }
 0x7b7   :  { %v2811_v6 = vpop.eup %2810  ;;  %760 = vrot.lane.b32.xlu0 %v2809_v38, %s3103_s5 }
 0x7b8   :  { %772 = vrot.lane.b32.xlu1 %v2811_v6, %s3103_s5 }
 0x7ba   :  { %v2813_v42 = vpop.eup %2812 }
 0x7bb   :  { %v2815_v7 = vpop.eup %2814  ;;  %762 = vrot.lane.b32.xlu0 %v2813_v42, %s3103_s5 }
 0x7bc   :  { %774 = vrot.lane.b32.xlu1 %v2815_v7, %s3103_s5 }
 0x829   :  { %v761_v43 = vpop.permute.xlu0 %760 }
 0x82a   :  { %v3396_v10 = vmul.f32 %v2801_v5, %v761_v43  ;;  %v773_v11 = vpop.permute.xlu1 %772 }
 0x82b   :  { %v3398_v16 = vmul.f32 %v2803_v44, %v773_v11  ;;  %v842_v44 = vld [vmem:[#allocation2 + $0x78] sm:$0xff] }
 0x82c   :  { %822 = vrot.lane.b32.xlu0 %v3396_v10, %s3104_s26 }
 0x82d   :  { %v763_v17 = vpop.permute.xlu0 %762  ;;  %830 = vrot.lane.b32.xlu1 %v3398_v16, %s3103_s5 }
 0x82e   :  { %v3404_v19 = vmul.f32 %v2805_v47, %v763_v17  ;;  %v775_v22 = vpop.permute.xlu1 %774 }
 0x82f   :  { %v3406_v23 = vmul.f32 %v2807_v51, %v775_v22 }
 0x830   :  { %824 = vrot.lane.b32.xlu0 %v3404_v19, %s3104_s26 }
 0x831   :  { %832 = vrot.lane.b32.xlu1 %v3406_v23, %s3103_s5 }
 0x89e   :  { %v823_v25 = vpop.permute.xlu0 %822 }
 0x89f   :  { %v831_v26 = vpop.permute.xlu1 %830 }
 0x8a0   :  { %v836_v28 = vsel %vm343_vm0, %v823_v25, %v831_v26 }
 0x8a1   :  { %2313 = vmatmul.mubr.msk.f32.vlgmr.msra.gmra.mrb[4].mxu1 %vm106_vm1, %v836_v28 }
 0x8a2   :  { %v825_v30 = vpop.permute.xlu0 %824  ;;  %919 = vmatprep.mubr.f32.mxu1 %v3102_v0  ;;  %2532 = vmatpush1.bf16.msra.mxu1 %v3212_v8 }
 0x8a3   :  { %v833_v32 = vpop.permute.xlu1 %832  ;;  %2534 = vmatprep.subr.bf16.mxu1 %v3214_v9 }
 0x8a4   :  { %v837_v34 = vsel %vm343_vm0, %v825_v30, %v833_v32 }
 0x8a5   :  { %2314 = vmatmul.mubr.msk.f32.gmra.mrb[6].mxu1 %vm106_vm1, %v837_v34 }
 0x8a6   :  { %2536 = vmatpush1.bf16.msra.mxu1 %v3219_v14  ;;  %1405 = vmatprep.mubr.f32.mxu1 %v3102_v0 }
 0x8a7   :  { %2538 = vmatprep.subr.bf16.mxu1 %v3223_v15 }
 0x8aa   :  { %2540 = vmatpush1.bf16.msra.mxu1 %v3227_v20 }
 0x8ab   :  { %2542 = vmatprep.subr.bf16.mxu1 %v3231_v21 }
 0x8ae   :  { %2544 = vmatpush1.bf16.msra.mxu1 %v3235_v24 }
 0x8af   :  { %2562 = vmatprep.subr.bf16.mxu1 %v3210_v4 }
 0x974   :  { %v915_v39 = vpop.f32.mrb[4].mxu1 }
 0x975   :  { %v926_v40 = vadd.f32 %v915_v39, %v839_v35  ;;  %v917_v41 = vpop.f32.mrb[5].mxu1 }
 0x976   :  { %v927_v5 = vadd.f32 %v917_v41, %v840_v37 }
 0x977   :  { %2816 = vtanh.f32 %v926_v40  ;;  %v2315_v54 = vmul.f32 -1.442695, %v926_v40 }
 0x978   :  { %2818 = vtanh.f32 %v927_v5  ;;  %v921_v12 = vpop.f32.mrb[6].mxu1  ;;  %v2317_v55 = vmul.f32 -1.442695, %v927_v5 }
 0x979   :  { %v928_v45 = vadd.f32 %v921_v12, %v841_v13  ;;  %v923_v18 = vpop.f32.mrb[7].mxu1 }
 0x97a   :  { %v929_v47 = vadd.f32 %v923_v18, %v842_v44 }
 0x97b   :  { %2820 = vtanh.f32 %v928_v45  ;;  %v2316_v56 = vmul.f32 -1.442695, %v928_v45 }
 0x97c   :  { %2822 = vtanh.f32 %v929_v47  ;;  %v2318_v57 = vmul.f32 -1.442695, %v929_v47 }
 0x97d   :  { %2824 = vpow2.f32 %v2315_v54 }
 0x97e   :  { %2826 = vpow2.f32 %v2317_v55 }
 0x97f   :  { %2828 = vpow2.f32 %v2316_v56 }
 0x980   :  { %2830 = vpow2.f32 %v2318_v57 }
 0x981   :  { %v2817_v49 = vpop.eup %2816 }
 0x982   :  { %v2819_v51 = vpop.eup %2818  ;;  %962 = vrot.lane.b32.xlu0 %v2817_v49, %s3103_s5 }
 0x983   :  { %984 = vrot.lane.b32.xlu1 %v2819_v51, %s3103_s5 }
 0x985   :  { %v2821_v4 = vpop.eup %2820 }
 0x986   :  { %v2823_v53 = vpop.eup %2822  ;;  %964 = vrot.lane.b32.xlu0 %v2821_v4, %s3103_s5 }
 0x987   :  { %986 = vrot.lane.b32.xlu1 %v2823_v53, %s3103_s5  ;;  %v2825_v58 = vpop.eup %2824 }
 0x988   :  { %v2827_v60 = vpop.eup %2826  ;;  %v936_v62 = vadd.f32 1.0, %v2825_v58 }
 0x989   :  { %v2829_v63 = vpop.eup %2828  ;;  %v950_v1 = vadd.f32 1.0, %v2827_v60 }
 0x98a   :  { %v2831_v36 = vpop.eup %2830  ;;  %2832 = vrcp.f32 %v936_v62  ;;  %v937_v38 = vadd.f32 1.0, %v2829_v63 }
 0x98b   :  { %2834 = vrcp.f32 %v950_v1  ;;  %v951_v6 = vadd.f32 1.0, %v2831_v36 }
 0x98c   :  { %2836 = vrcp.f32 %v937_v38  ;;  %v1085_v38 = vld [vmem:[#allocation2 + $0x80] sm:$0xff] }
 0x98d   :  { %2838 = vrcp.f32 %v951_v6  ;;  %v1086_v6 = vld [vmem:[#allocation2 + $0x88] sm:$0xff] }
 0x994   :  { %v2833_v42 = vpop.eup %2832 }
 0x995   :  { %v2835_v43 = vpop.eup %2834  ;;  %v958_v35 = vmul.f32 %v2833_v42, %v3378_v59 }
 0x996   :  { %v2837_v25 = vpop.eup %2836  ;;  %v980_v39 = vmul.f32 %v2835_v43, %v3380_v61 }
 0x997   :  { %v2839_v28 = vpop.eup %2838  ;;  %v959_v13 = vmul.f32 %v2837_v25, %v3386_v2 }
 0x998   :  { %v981_v12 = vmul.f32 %v2839_v28, %v3388_v3 }
 0x9f4   :  { %v963_v7 = vpop.permute.xlu0 %962 }
 0x9f5   :  { %v968_v11 = vmul.f32 %v2833_v42, %v963_v7  ;;  %v985_v17 = vpop.permute.xlu1 %984 }
 0x9f6   :  { %v990_v22 = vmul.f32 %v2835_v43, %v985_v17  ;;  %v1087_v17 = vld [vmem:[#allocation2 + $0x90] sm:$0xff] }
 0x9f7   :  { %972 = vrot.lane.b32.xlu0 %v968_v11, %s3104_s26 }
 0x9f8   :  { %v965_v26 = vpop.permute.xlu0 %964  ;;  %994 = vrot.lane.b32.xlu1 %v990_v22, %s3104_s26  ;;  %v1088_v22 = vld [vmem:[#allocation2 + $0x98] sm:$0xff] }
 0x9f9   :  { %v969_v30 = vmul.f32 %v2837_v25, %v965_v26  ;;  %v987_v32 = vpop.permute.xlu1 %986 }
 0x9fa   :  { %v991_v34 = vmul.f32 %v2839_v28, %v987_v32 }
 0x9fb   :  { %974 = vrot.lane.b32.xlu0 %v969_v30, %s3104_s26 }
 0x9fc   :  { %996 = vrot.lane.b32.xlu1 %v991_v34, %s3104_s26 }
 0xa69   :  { %v973_v37 = vpop.permute.xlu0 %972 }
 0xa6a   :  { %v3436_v40 = vadd.f32 %v973_v37, %v958_v35  ;;  %v995_v41 = vpop.permute.xlu1 %994 }
 0xa6b   :  { %v3438_v5 = vadd.f32 %v995_v41, %v980_v39 }
 0xa6c   :  { %2840 = vtanh.f32 %v3436_v40 }
 0xa6d   :  { %2842 = vtanh.f32 %v3438_v5  ;;  %v975_v44 = vpop.permute.xlu0 %974 }
 0xa6e   :  { %v3444_v45 = vadd.f32 %v975_v44, %v959_v13  ;;  %v997_v59 = vpop.permute.xlu1 %996 }
 0xa6f   :  { %v3446_v18 = vadd.f32 %v997_v59, %v981_v12 }
 0xa70   :  { %2844 = vtanh.f32 %v3444_v45 }
 0xa71   :  { %2846 = vtanh.f32 %v3446_v18 }
 0xa76   :  { %v2841_v61 = vpop.eup %2840 }
 0xa77   :  { %v2843_v47 = vpop.eup %2842  ;;  %1006 = vrot.lane.b32.xlu0 %v2841_v61, %s3103_s5 }
 0xa78   :  { %1018 = vrot.lane.b32.xlu1 %v2843_v47, %s3103_s5 }
 0xa7a   :  { %v2845_v2 = vpop.eup %2844 }
 0xa7b   :  { %v2847_v49 = vpop.eup %2846  ;;  %1008 = vrot.lane.b32.xlu0 %v2845_v2, %s3103_s5 }
 0xa7c   :  { %1020 = vrot.lane.b32.xlu1 %v2847_v49, %s3103_s5 }
 0xae9   :  { %v1007_v3 = vpop.permute.xlu0 %1006 }
 0xaea   :  { %v3454_v51 = vmul.f32 %v2833_v42, %v1007_v3  ;;  %v1019_v4 = vpop.permute.xlu1 %1018 }
 0xaeb   :  { %v3456_v53 = vmul.f32 %v2835_v43, %v1019_v4 }
 0xaec   :  { %1068 = vrot.lane.b32.xlu0 %v3454_v51, %s3104_s26 }
 0xaed   :  { %v1009_v54 = vpop.permute.xlu0 %1008  ;;  %1076 = vrot.lane.b32.xlu1 %v3456_v53, %s3103_s5 }
 0xaee   :  { %v3462_v55 = vmul.f32 %v2837_v25, %v1009_v54  ;;  %v1021_v56 = vpop.permute.xlu1 %1020 }
 0xaef   :  { %v3464_v57 = vmul.f32 %v2839_v28, %v1021_v56 }
 0xaf0   :  { %1070 = vrot.lane.b32.xlu0 %v3462_v55, %s3104_s26 }
 0xaf1   :  { %1078 = vrot.lane.b32.xlu1 %v3464_v57, %s3103_s5 }
 0xb5e   :  { %v1069_v58 = vpop.permute.xlu0 %1068 }
 0xb5f   :  { %v1077_v60 = vpop.permute.xlu1 %1076 }
 0xb60   :  { %v1082_v62 = vsel %vm343_vm0, %v1069_v58, %v1077_v60 }
 0xb61   :  { %2323 = vmatmul.mubr.msk.f32.vlgmr.msra.gmra.mrb[8].mxu0 %vm106_vm1, %v1082_v62 }
 0xb62   :  { %v1071_v63 = vpop.permute.xlu0 %1070  ;;  %1165 = vmatprep.mubr.f32.mxu0 %v3102_v0  ;;  %2548 = vmatpush1.bf16.msra.mxu0 %v3212_v8 }
 0xb63   :  { %v1079_v1 = vpop.permute.xlu1 %1078  ;;  %2550 = vmatprep.subr.bf16.mxu0 %v3214_v9 }
 0xb64   :  { %v1083_v36 = vsel %vm343_vm0, %v1071_v63, %v1079_v1 }
 0xb65   :  { %2324 = vmatmul.mubr.msk.f32.gmra.mrb[10].mxu0 %vm106_vm1, %v1083_v36 }
 0xb66   :  { %2552 = vmatpush1.bf16.msra.mxu0 %v3219_v14  ;;  %1651 = vmatprep.mubr.f32.mxu0 %v3102_v0 }
 0xb67   :  { %2554 = vmatprep.subr.bf16.mxu0 %v3223_v15 }
 0xb6a   :  { %2556 = vmatpush1.bf16.msra.mxu0 %v3227_v20 }
 0xb6b   :  { %2558 = vmatprep.subr.bf16.mxu0 %v3231_v21 }
 0xb6e   :  { %2560 = vmatpush1.bf16.msra.mxu0 %v3235_v24 }
 0xc34   :  { %v1161_v42 = vpop.f32.mrb[8].mxu0 }
 0xc35   :  { %v1172_v7 = vadd.f32 %v1161_v42, %v1085_v38  ;;  %v1163_v43 = vpop.f32.mrb[9].mxu0 }
 0xc36   :  { %v1173_v11 = vadd.f32 %v1163_v43, %v1086_v6 }
 0xc37   :  { %2848 = vtanh.f32 %v1172_v7  ;;  %v2325_v39 = vmul.f32 -1.442695, %v1172_v7 }
 0xc38   :  { %2850 = vtanh.f32 %v1173_v11  ;;  %v1167_v25 = vpop.f32.mrb[10].mxu0  ;;  %v2327_v41 = vmul.f32 -1.442695, %v1173_v11 }
 0xc39   :  { %v1174_v26 = vadd.f32 %v1167_v25, %v1087_v17  ;;  %v1169_v28 = vpop.f32.mrb[11].mxu0 }
 0xc3a   :  { %v1175_v30 = vadd.f32 %v1169_v28, %v1088_v22 }
 0xc3b   :  { %2852 = vtanh.f32 %v1174_v26  ;;  %v2326_v13 = vmul.f32 -1.442695, %v1174_v26 }
 0xc3c   :  { %2854 = vtanh.f32 %v1175_v30  ;;  %v2328_v44 = vmul.f32 -1.442695, %v1175_v30 }
 0xc3d   :  { %2856 = vpow2.f32 %v2325_v39 }
 0xc3e   :  { %2858 = vpow2.f32 %v2327_v41 }
 0xc3f   :  { %2860 = vpow2.f32 %v2326_v13 }
 0xc40   :  { %2862 = vpow2.f32 %v2328_v44 }
 0xc41   :  { %v2849_v32 = vpop.eup %2848 }
 0xc42   :  { %v2851_v34 = vpop.eup %2850  ;;  %1208 = vrot.lane.b32.xlu0 %v2849_v32, %s3103_s5 }
 0xc43   :  { %1230 = vrot.lane.b32.xlu1 %v2851_v34, %s3103_s5 }
 0xc45   :  { %v2853_v35 = vpop.eup %2852 }
 0xc46   :  { %v2855_v37 = vpop.eup %2854  ;;  %1210 = vrot.lane.b32.xlu0 %v2853_v35, %s3103_s5 }
 0xc47   :  { %1232 = vrot.lane.b32.xlu1 %v2855_v37, %s3103_s5  ;;  %v2857_v12 = vpop.eup %2856 }
 0xc48   :  { %v2859_v59 = vpop.eup %2858  ;;  %v1182_v61 = vadd.f32 1.0, %v2857_v12 }
 0xc49   :  { %v2861_v47 = vpop.eup %2860  ;;  %v1196_v2 = vadd.f32 1.0, %v2859_v59 }
 0xc4a   :  { %v2863_v49 = vpop.eup %2862  ;;  %2864 = vrcp.f32 %v1182_v61  ;;  %v1183_v3 = vadd.f32 1.0, %v2861_v47 }
 0xc4b   :  { %2866 = vrcp.f32 %v1196_v2  ;;  %v1197_v4 = vadd.f32 1.0, %v2863_v49 }
 0xc4c   :  { %2868 = vrcp.f32 %v1183_v3 }
 0xc4d   :  { %2870 = vrcp.f32 %v1197_v4 }
 0xc54   :  { %v2865_v54 = vpop.eup %2864 }
 0xc55   :  { %v2867_v58 = vpop.eup %2866  ;;  %v1204_v43 = vmul.f32 %v2865_v54, %v3436_v40 }
 0xc56   :  { %v2869_v1 = vpop.eup %2868  ;;  %v1226_v17 = vmul.f32 %v2867_v58, %v3438_v5 }
 0xc57   :  { %v2871_v38 = vpop.eup %2870  ;;  %v1205_v28 = vmul.f32 %v2869_v1, %v3444_v45 }
 0xc58   :  { %v1227_v32 = vmul.f32 %v2871_v38, %v3446_v18 }
 0xcb4   :  { %v1209_v56 = vpop.permute.xlu0 %1208 }
 0xcb5   :  { %v1214_v60 = vmul.f32 %v2865_v54, %v1209_v56  ;;  %v1231_v62 = vpop.permute.xlu1 %1230 }
 0xcb6   :  { %v1236_v63 = vmul.f32 %v2867_v58, %v1231_v62 }
 0xcb7   :  { %1218 = vrot.lane.b32.xlu0 %v1214_v60, %s3104_s26 }
 0xcb8   :  { %v1211_v36 = vpop.permute.xlu0 %1210  ;;  %1240 = vrot.lane.b32.xlu1 %v1236_v63, %s3104_s26 }
 0xcb9   :  { %v1215_v6 = vmul.f32 %v2869_v1, %v1211_v36  ;;  %v1233_v42 = vpop.permute.xlu1 %1232  ;;  %v1334_v36 = vld [vmem:[#allocation2 + $0xb8] sm:$0xff] }
 0xcba   :  { %v1237_v7 = vmul.f32 %v2871_v38, %v1233_v42 }
 0xcbb   :  { %1220 = vrot.lane.b32.xlu0 %v1215_v6, %s3104_s26 }
 0xcbc   :  { %1242 = vrot.lane.b32.xlu1 %v1237_v7, %s3104_s26 }
 0xd29   :  { %v1219_v11 = vpop.permute.xlu0 %1218 }
 0xd2a   :  { %v3493_v22 = vadd.f32 %v1219_v11, %v1204_v43  ;;  %v1241_v25 = vpop.permute.xlu1 %1240 }
 0xd2b   :  { %v3495_v26 = vadd.f32 %v1241_v25, %v1226_v17 }
 0xd2c   :  { %2872 = vtanh.f32 %v3493_v22 }
 0xd2d   :  { %2874 = vtanh.f32 %v3495_v26  ;;  %v1221_v30 = vpop.permute.xlu0 %1220 }
 0xd2e   :  { %v3501_v34 = vadd.f32 %v1221_v30, %v1205_v28  ;;  %v1243_v40 = vpop.permute.xlu1 %1242 }
 0xd2f   :  { %v3503_v35 = vadd.f32 %v1243_v40, %v1227_v32 }
 0xd30   :  { %2876 = vtanh.f32 %v3501_v34 }
 0xd31   :  { %2878 = vtanh.f32 %v3503_v35 }
 0xd36   :  { %v2873_v5 = vpop.eup %2872 }
 0xd37   :  { %v2875_v37 = vpop.eup %2874  ;;  %1252 = vrot.lane.b32.xlu0 %v2873_v5, %s3103_s5 }
 0xd38   :  { %1264 = vrot.lane.b32.xlu1 %v2875_v37, %s3103_s5 }
 0xd3a   :  { %v2877_v45 = vpop.eup %2876 }
 0xd3b   :  { %v2879_v39 = vpop.eup %2878  ;;  %1254 = vrot.lane.b32.xlu0 %v2877_v45, %s3103_s5 }
 0xd3c   :  { %1266 = vrot.lane.b32.xlu1 %v2879_v39, %s3103_s5 }
 0xda9   :  { %v1253_v18 = vpop.permute.xlu0 %1252 }
 0xdaa   :  { %v3511_v41 = vmul.f32 %v2865_v54, %v1253_v18  ;;  %v1265_v13 = vpop.permute.xlu1 %1264 }
 0xdab   :  { %v3513_v44 = vmul.f32 %v2867_v58, %v1265_v13  ;;  %v1332_v58 = vld [vmem:[#allocation2 + $0xa8] sm:$0xff] }
 0xdac   :  { %1314 = vrot.lane.b32.xlu0 %v3511_v41, %s3104_s26 }
 0xdad   :  { %v1255_v12 = vpop.permute.xlu0 %1254  ;;  %1322 = vrot.lane.b32.xlu1 %v3513_v44, %s3103_s5 }
 0xdae   :  { %v3519_v59 = vmul.f32 %v2869_v1, %v1255_v12  ;;  %v1267_v61 = vpop.permute.xlu1 %1266  ;;  %v1333_v1 = vld [vmem:[#allocation2 + $0xb0] sm:$0xff] }
 0xdaf   :  { %v3521_v47 = vmul.f32 %v2871_v38, %v1267_v61 }
 0xdb0   :  { %1316 = vrot.lane.b32.xlu0 %v3519_v59, %s3104_s26 }
 0xdb1   :  { %1324 = vrot.lane.b32.xlu1 %v3521_v47, %s3103_s5 }
 0xe1e   :  { %v1315_v2 = vpop.permute.xlu0 %1314 }
 0xe1f   :  { %v1323_v49 = vpop.permute.xlu1 %1322 }
 0xe20   :  { %v1328_v3 = vsel %vm343_vm0, %v1315_v2, %v1323_v49 }
 0xe21   :  { %2333 = vmatmul.mubr.msk.f32.vlgmr.msra.gmra.mrb[8].mxu1 %vm106_vm1, %v1328_v3 }
 0xe22   :  { %v1317_v4 = vpop.permute.xlu0 %1316  ;;  %1411 = vmatprep.mubr.f32.mxu1 %v3102_v0  ;;  %2564 = vmatpush1.bf16.msra.mxu1 %v3212_v8  ;;  %v1331_v8 = vld [vmem:[#allocation2 + $0xa0] sm:$0xff] }
 0xe23   :  { %v1325_v54 = vpop.permute.xlu1 %1324  ;;  %2566 = vmatprep.subr.bf16.mxu1 %v3214_v9 }
 0xe24   :  { %v1329_v56 = vsel %vm343_vm0, %v1317_v4, %v1325_v54 }
 0xe25   :  { %2334 = vmatmul.mubr.msk.f32.gmra.mrb[10].mxu1 %vm106_vm1, %v1329_v56 }
 0xe26   :  { %2568 = vmatpush1.bf16.msra.mxu1 %v3219_v14  ;;  %1897 = vmatprep.mubr.f32.mxu1 %v3102_v0 }
 0xe27   :  { %2570 = vmatprep.subr.bf16.mxu1 %v3223_v15 }
 0xe2a   :  { %2572 = vmatpush1.bf16.msra.mxu1 %v3227_v20 }
 0xe2b   :  { %2574 = vmatprep.subr.bf16.mxu1 %v3231_v21 }
 0xe2e   :  { %2576 = vmatpush1.bf16.msra.mxu1 %v3235_v24 }
 0xef4   :  { %v1407_v60 = vpop.f32.mrb[8].mxu1 }
 0xef5   :  { %v1418_v9 = vadd.f32 %v1407_v60, %v1331_v8  ;;  %v1409_v62 = vpop.f32.mrb[9].mxu1 }
 0xef6   :  { %v1419_v63 = vadd.f32 %v1409_v62, %v1332_v58 }
 0xef7   :  { %2880 = vtanh.f32 %v1418_v9  ;;  %v2335_v7 = vmul.f32 -1.442695, %v1418_v9 }
 0xef8   :  { %2882 = vtanh.f32 %v1419_v63  ;;  %v1413_v14 = vpop.f32.mrb[10].mxu1  ;;  %v2337_v43 = vmul.f32 -1.442695, %v1419_v63 }
 0xef9   :  { %v1420_v38 = vadd.f32 %v1413_v14, %v1333_v1  ;;  %v1415_v6 = vpop.f32.mrb[11].mxu1 }
 0xefa   :  { %v1421_v15 = vadd.f32 %v1415_v6, %v1334_v36 }
 0xefb   :  { %2884 = vtanh.f32 %v1420_v38  ;;  %v2336_v11 = vmul.f32 -1.442695, %v1420_v38 }
 0xefc   :  { %2886 = vtanh.f32 %v1421_v15  ;;  %v2338_v17 = vmul.f32 -1.442695, %v1421_v15 }
 0xefd   :  { %2888 = vpow2.f32 %v2335_v7 }
 0xefe   :  { %2890 = vpow2.f32 %v2337_v43 }
 0xeff   :  { %2892 = vpow2.f32 %v2336_v11 }
 0xf00   :  { %2894 = vpow2.f32 %v2338_v17 }
 0xf01   :  { %v2881_v20 = vpop.eup %2880 }
 0xf02   :  { %v2883_v21 = vpop.eup %2882  ;;  %1454 = vrot.lane.b32.xlu0 %v2881_v20, %s3103_s5 }
 0xf03   :  { %1476 = vrot.lane.b32.xlu1 %v2883_v21, %s3103_s5 }
 0xf05   :  { %v2885_v24 = vpop.eup %2884 }
 0xf06   :  { %v2887_v42 = vpop.eup %2886  ;;  %1456 = vrot.lane.b32.xlu0 %v2885_v24, %s3103_s5 }
 0xf07   :  { %1478 = vrot.lane.b32.xlu1 %v2887_v42, %s3103_s5  ;;  %v2889_v25 = vpop.eup %2888 }
 0xf08   :  { %v2891_v28 = vpop.eup %2890  ;;  %v1428_v30 = vadd.f32 1.0, %v2889_v25 }
 0xf09   :  { %v2893_v32 = vpop.eup %2892  ;;  %v1442_v40 = vadd.f32 1.0, %v2891_v28 }
 0xf0a   :  { %v2895_v5 = vpop.eup %2894  ;;  %2896 = vrcp.f32 %v1428_v30  ;;  %v1429_v37 = vadd.f32 1.0, %v2893_v32 }
 0xf0b   :  { %2898 = vrcp.f32 %v1442_v40  ;;  %v1443_v45 = vadd.f32 1.0, %v2895_v5 }
 0xf0c   :  { %2900 = vrcp.f32 %v1429_v37 }
 0xf0d   :  { %2902 = vrcp.f32 %v1443_v45  ;;  %v1577_v45 = vld [vmem:[#allocation2 + $0xc0] sm:$0xff] }
 0xf14   :  { %v2897_v39 = vpop.eup %2896 }
 0xf15   :  { %v2899_v13 = vpop.eup %2898  ;;  %v1450_v58 = vmul.f32 %v2897_v39, %v3493_v22 }
 0xf16   :  { %v2901_v49 = vpop.eup %2900  ;;  %v1472_v9 = vmul.f32 %v2899_v13, %v3495_v26 }
 0xf17   :  { %v2903_v4 = vpop.eup %2902  ;;  %v1451_v36 = vmul.f32 %v2901_v49, %v3501_v34 }
 0xf18   :  { %v1473_v38 = vmul.f32 %v2903_v4, %v3503_v35 }
 0xf74   :  { %v1455_v18 = vpop.permute.xlu0 %1454 }
 0xf75   :  { %v1460_v12 = vmul.f32 %v2897_v39, %v1455_v18  ;;  %v1477_v61 = vpop.permute.xlu1 %1476 }
 0xf76   :  { %v1482_v2 = vmul.f32 %v2899_v13, %v1477_v61 }
 0xf77   :  { %1464 = vrot.lane.b32.xlu0 %v1460_v12, %s3104_s26 }
 0xf78   :  { %v1457_v3 = vpop.permute.xlu0 %1456  ;;  %1486 = vrot.lane.b32.xlu1 %v1482_v2, %s3104_s26  ;;  %v1579_v2 = vld [vmem:[#allocation2 + $0xd0] sm:$0xff] }
 0xf79   :  { %v1461_v54 = vmul.f32 %v2901_v49, %v1457_v3  ;;  %v1479_v56 = vpop.permute.xlu1 %1478 }
 0xf7a   :  { %v1483_v8 = vmul.f32 %v2903_v4, %v1479_v56 }
 0xf7b   :  { %1466 = vrot.lane.b32.xlu0 %v1461_v54, %s3104_s26 }
 0xf7c   :  { %1488 = vrot.lane.b32.xlu1 %v1483_v8, %s3104_s26 }
 0xfe9   :  { %v1465_v60 = vpop.permute.xlu0 %1464 }
 0xfea   :  { %v3550_v62 = vadd.f32 %v1465_v60, %v1450_v58  ;;  %v1487_v63 = vpop.permute.xlu1 %1486 }
 0xfeb   :  { %v3552_v1 = vadd.f32 %v1487_v63, %v1472_v9 }
 0xfec   :  { %2904 = vtanh.f32 %v3550_v62 }
 0xfed   :  { %2906 = vtanh.f32 %v3552_v1  ;;  %v1467_v14 = vpop.permute.xlu0 %1466 }
 0xfee   :  { %v3558_v6 = vadd.f32 %v1467_v14, %v1451_v36  ;;  %v1489_v22 = vpop.permute.xlu1 %1488 }
 0xfef   :  { %v3560_v15 = vadd.f32 %v1489_v22, %v1473_v38 }
 0xff0   :  { %2908 = vtanh.f32 %v3558_v6 }
 0xff1   :  { %2910 = vtanh.f32 %v3560_v15 }
 0xff6   :  { %v2905_v26 = vpop.eup %2904 }
 0xff7   :  { %v2907_v20 = vpop.eup %2906  ;;  %1498 = vrot.lane.b32.xlu0 %v2905_v26, %s3103_s5 }
 0xff8   :  { %1510 = vrot.lane.b32.xlu1 %v2907_v20, %s3103_s5 }
 0xffa   :  { %v2909_v34 = vpop.eup %2908 }
 0xffb   :  { %v2911_v21 = vpop.eup %2910  ;;  %1500 = vrot.lane.b32.xlu0 %v2909_v34, %s3103_s5 }
 0xffc   :  { %1512 = vrot.lane.b32.xlu1 %v2911_v21, %s3103_s5 }
0x1069   :  { %v1499_v35 = vpop.permute.xlu0 %1498 }
0x106a   :  { %v3568_v24 = vmul.f32 %v2897_v39, %v1499_v35  ;;  %v1511_v42 = vpop.permute.xlu1 %1510  ;;  %v1578_v39 = vld [vmem:[#allocation2 + $0xc8] sm:$0xff] }
0x106b   :  { %v3570_v7 = vmul.f32 %v2899_v13, %v1511_v42 }
0x106c   :  { %1560 = vrot.lane.b32.xlu0 %v3568_v24, %s3104_s26 }
0x106d   :  { %v1501_v43 = vpop.permute.xlu0 %1500  ;;  %1568 = vrot.lane.b32.xlu1 %v3570_v7, %s3103_s5 }
0x106e   :  { %v3576_v11 = vmul.f32 %v2901_v49, %v1501_v43  ;;  %v1513_v17 = vpop.permute.xlu1 %1512  ;;  %v1580_v49 = vld [vmem:[#allocation2 + $0xd8] sm:$0xff] }
0x106f   :  { %v3578_v25 = vmul.f32 %v2903_v4, %v1513_v17 }
0x1070   :  { %1562 = vrot.lane.b32.xlu0 %v3576_v11, %s3104_s26 }
0x1071   :  { %1570 = vrot.lane.b32.xlu1 %v3578_v25, %s3103_s5 }
0x10de   :  { %v1561_v28 = vpop.permute.xlu0 %1560 }
0x10df   :  { %v1569_v30 = vpop.permute.xlu1 %1568 }
0x10e0   :  { %v1574_v32 = vsel %vm343_vm0, %v1561_v28, %v1569_v30 }
0x10e1   :  { %2343 = vmatmul.mubr.msk.f32.vlgmr.msra.gmra.mrb[12].mxu0 %vm106_vm1, %v1574_v32 }
0x10e2   :  { %v1563_v40 = vpop.permute.xlu0 %1562  ;;  %1657 = vmatprep.mubr.f32.mxu0 %v3102_v0 }
0x10e3   :  { %v1571_v5 = vpop.permute.xlu1 %1570 }
0x10e4   :  { %v1575_v37 = vsel %vm343_vm0, %v1563_v40, %v1571_v5 }
0x10e5   :  { %2344 = vmatmul.mubr.msk.f32.gmra.mrb[14].mxu0 %vm106_vm1, %v1575_v37 }
0x11b4   :  { %v1653_v18 = vpop.f32.mrb[12].mxu0 }
0x11b5   :  { %v1664_v13 = vadd.f32 %v1653_v18, %v1577_v45  ;;  %v1655_v12 = vpop.f32.mrb[13].mxu0 }
0x11b6   :  { %v1665_v61 = vadd.f32 %v1655_v12, %v1578_v39 }
0x11b7   :  { %2912 = vtanh.f32 %v1664_v13  ;;  %v2345_v63 = vmul.f32 -1.442695, %v1664_v13 }
0x11b8   :  { %2914 = vtanh.f32 %v1665_v61  ;;  %v1659_v3 = vpop.f32.mrb[14].mxu0  ;;  %v2347_v36 = vmul.f32 -1.442695, %v1665_v61 }
0x11b9   :  { %v1666_v4 = vadd.f32 %v1659_v3, %v1579_v2  ;;  %v1661_v54 = vpop.f32.mrb[15].mxu0 }
0x11ba   :  { %v1667_v56 = vadd.f32 %v1661_v54, %v1580_v49 }
0x11bb   :  { %2916 = vtanh.f32 %v1666_v4  ;;  %v2346_v14 = vmul.f32 -1.442695, %v1666_v4 }
0x11bc   :  { %2918 = vtanh.f32 %v1667_v56  ;;  %v2348_v38 = vmul.f32 -1.442695, %v1667_v56 }
0x11bd   :  { %2920 = vpow2.f32 %v2345_v63 }
0x11be   :  { %2922 = vpow2.f32 %v2347_v36 }
0x11bf   :  { %2924 = vpow2.f32 %v2346_v14 }
0x11c0   :  { %2926 = vpow2.f32 %v2348_v38 }
0x11c1   :  { %v2913_v8 = vpop.eup %2912 }
0x11c2   :  { %v2915_v58 = vpop.eup %2914  ;;  %1700 = vrot.lane.b32.xlu0 %v2913_v8, %s3103_s5 }
0x11c3   :  { %1722 = vrot.lane.b32.xlu1 %v2915_v58, %s3103_s5 }
0x11c5   :  { %v2917_v60 = vpop.eup %2916 }
0x11c6   :  { %v2919_v9 = vpop.eup %2918  ;;  %1702 = vrot.lane.b32.xlu0 %v2917_v60, %s3103_s5 }
0x11c7   :  { %1724 = vrot.lane.b32.xlu1 %v2919_v9, %s3103_s5  ;;  %v2921_v22 = vpop.eup %2920 }
0x11c8   :  { %v2923_v26 = vpop.eup %2922  ;;  %v1674_v20 = vadd.f32 1.0, %v2921_v22 }
0x11c9   :  { %v2925_v34 = vpop.eup %2924  ;;  %v1688_v21 = vadd.f32 1.0, %v2923_v26 }
0x11ca   :  { %v2927_v35 = vpop.eup %2926  ;;  %2928 = vrcp.f32 %v1674_v20  ;;  %v1675_v42 = vadd.f32 1.0, %v2925_v34 }
0x11cb   :  { %2930 = vrcp.f32 %v1688_v21  ;;  %v1689_v43 = vadd.f32 1.0, %v2927_v35 }
0x11cc   :  { %2932 = vrcp.f32 %v1675_v42 }
0x11cd   :  { %2934 = vrcp.f32 %v1689_v43 }
0x11d4   :  { %v2929_v17 = vpop.eup %2928 }
0x11d5   :  { %v2931_v30 = vpop.eup %2930  ;;  %v1696_v61 = vmul.f32 %v2929_v17, %v3550_v62 }
0x11d6   :  { %v2933_v37 = vpop.eup %2932  ;;  %v1718_v49 = vmul.f32 %v2931_v30, %v3552_v1 }
0x11d7   :  { %v2935_v39 = vpop.eup %2934  ;;  %v1697_v56 = vmul.f32 %v2933_v37, %v3558_v6 }
0x11d8   :  { %v1719_v58 = vmul.f32 %v2935_v39, %v3560_v15 }
0x1234   :  { %v1701_v28 = vpop.permute.xlu0 %1700 }
0x1235   :  { %v1706_v32 = vmul.f32 %v2929_v17, %v1701_v28  ;;  %v1723_v40 = vpop.permute.xlu1 %1722 }
0x1236   :  { %v1728_v5 = vmul.f32 %v2931_v30, %v1723_v40  ;;  %v1824_v40 = vld [vmem:[#allocation2 + $0xe8] sm:$0xff] }
0x1237   :  { %1710 = vrot.lane.b32.xlu0 %v1706_v32, %s3104_s26  ;;  %v1823_v32 = vld [vmem:[#allocation2 + $0xe0] sm:$0xff] }
0x1238   :  { %v1703_v45 = vpop.permute.xlu0 %1702  ;;  %1732 = vrot.lane.b32.xlu1 %v1728_v5, %s3104_s26 }
0x1239   :  { %v1707_v18 = vmul.f32 %v2933_v37, %v1703_v45  ;;  %v1725_v13 = vpop.permute.xlu1 %1724 }
0x123a   :  { %v1729_v12 = vmul.f32 %v2935_v39, %v1725_v13  ;;  %v1826_v13 = vld [vmem:[#allocation2 + $0xf8] sm:$0xff] }
0x123b   :  { %1712 = vrot.lane.b32.xlu0 %v1707_v18, %s3104_s26  ;;  %v1825_v18 = vld [vmem:[#allocation2 + $0xf0] sm:$0xff] }
0x123c   :  { %1734 = vrot.lane.b32.xlu1 %v1729_v12, %s3104_s26 }
0x12a9   :  { %v1711_v2 = vpop.permute.xlu0 %1710 }
0x12aa   :  { %v3599_v3 = vadd.f32 %v1711_v2, %v1696_v61  ;;  %v1733_v4 = vpop.permute.xlu1 %1732 }
0x12ab   :  { %v3601_v54 = vadd.f32 %v1733_v4, %v1718_v49  ;;  %v3105_v4 = vmov 0  }
0x12ac   :  { %2936 = vtanh.f32 %v3599_v3  ;;  %2638 = vset.pattern.permute.xlu0 %v3105_v4  ;;  %2644 = vset.pattern.permute.xlu1 %v3105_v4 }
0x12ad   :  { %2938 = vtanh.f32 %v3601_v54  ;;  %v1713_v8 = vpop.permute.xlu0 %1712 }
0x12ae   :  { %v3607_v60 = vadd.f32 %v1713_v8, %v1697_v56  ;;  %v1735_v62 = vpop.permute.xlu1 %1734 }
0x12af   :  { %v3609_v9 = vadd.f32 %v1735_v62, %v1719_v58 }
0x12b0   :  { %2940 = vtanh.f32 %v3607_v60 }
0x12b1   :  { %2942 = vtanh.f32 %v3609_v9 }
0x12b6   :  { %v2937_v1 = vpop.eup %2936 }
0x12b7   :  { %v2939_v63 = vpop.eup %2938  ;;  %1744 = vrot.lane.b32.xlu0 %v2937_v1, %s3103_s5 }
0x12b8   :  { %1756 = vrot.lane.b32.xlu1 %v2939_v63, %s3103_s5 }
0x12ba   :  { %v2941_v6 = vpop.eup %2940 }
0x12bb   :  { %v2943_v36 = vpop.eup %2942  ;;  %1746 = vrot.lane.b32.xlu0 %v2941_v6, %s3103_s5 }
0x12bc   :  { %1758 = vrot.lane.b32.xlu1 %v2943_v36, %s3103_s5 }
0x1329   :  { %v1745_v15 = vpop.permute.xlu0 %1744 }
0x132a   :  { %v3617_v14 = vmul.f32 %v2929_v17, %v1745_v15  ;;  %v1757_v38 = vpop.permute.xlu1 %1756 }
0x132b   :  { %v3619_v22 = vmul.f32 %v2931_v30, %v1757_v38 }
0x132c   :  { %1806 = vrot.lane.b32.xlu0 %v3617_v14, %s3104_s26 }
0x132d   :  { %v1747_v26 = vpop.permute.xlu0 %1746  ;;  %1814 = vrot.lane.b32.xlu1 %v3619_v22, %s3103_s5 }
0x132e   :  { %v3625_v20 = vmul.f32 %v2933_v37, %v1747_v26  ;;  %v1759_v34 = vpop.permute.xlu1 %1758 }
0x132f   :  { %v3627_v21 = vmul.f32 %v2935_v39, %v1759_v34 }
0x1330   :  { %1808 = vrot.lane.b32.xlu0 %v3625_v20, %s3104_s26 }
0x1331   :  { %1816 = vrot.lane.b32.xlu1 %v3627_v21, %s3103_s5 }
0x139e   :  { %v1807_v35 = vpop.permute.xlu0 %1806 }
0x139f   :  { %v1815_v42 = vpop.permute.xlu1 %1814 }
0x13a0   :  { %v1820_v43 = vsel %vm343_vm0, %v1807_v35, %v1815_v42 }
0x13a1   :  { %2353 = vmatmul.mubr.msk.f32.vlgmr.msra.gmra.mrb[12].mxu1 %vm106_vm1, %v1820_v43 }
0x13a2   :  { %v1809_v17 = vpop.permute.xlu0 %1808  ;;  %1903 = vmatprep.mubr.f32.mxu1 %v3102_v0 }
0x13a3   :  { %v1817_v28 = vpop.permute.xlu1 %1816 }
0x13a4   :  { %v1821_v30 = vsel %vm343_vm0, %v1809_v17, %v1817_v28  ;;  %v3645_v28 = vld [vmem:[%s3816_s1] sm:$0xff] }
0x13a5   :  { %2354 = vmatmul.mubr.msk.f32.gmra.mrb[14].mxu1 %vm106_vm1, %v1821_v30  ;;  %v3648_v30 = vsub.s32 7, %v3645_v28  ;;  %vm287_vm2 = vcmp.eq.s32.totalorder %v3645_v28, 0  ;;  %vm534_vm4 = vcmp.eq.s32.totalorder %v3645_v28, 1  ;;  %vm780_vm12 = vcmp.eq.s32.totalorder %v3645_v28, 2 }
0x13a6   :  { %v2299_v4 = vsel %vm534_vm4, 1.0, %v3102_v0 }
0x13a7   :  { %vm293_vm3 = vcmp.eq.s32.totalorder %v3648_v30, 0  ;;  %vm540_vm5 = vcmp.eq.s32.totalorder %v3648_v30, 1  ;;  %vm786_vm13 = vcmp.eq.s32.totalorder %v3648_v30, 2 }
0x1474   :  { %v1899_v5 = vpop.f32.mrb[12].mxu1 }
0x1475   :  { %v1910_v37 = vadd.f32 %v1899_v5, %v1823_v32  ;;  %v1901_v45 = vpop.f32.mrb[13].mxu1  ;;  %v3653_v32 = vld [vmem:[%s3816_s1 + $0x8] sm:$0xff] }
0x1476   :  { %v1911_v39 = vadd.f32 %v1901_v45, %v1824_v40  ;;  %vm535_vm6 = vcmp.eq.s32.totalorder %v3653_v32, 1  ;;  %vm288_vm8 = vcmp.eq.s32.totalorder %v3653_v32, 0  ;;  %vm781_vm10 = vcmp.eq.s32.totalorder %v3653_v32, 2 }
0x1477   :  { %2944 = vtanh.f32 %v1910_v37  ;;  %v2355_v1 = vmul.f32 -1.442695, %v1910_v37  ;;  %vm1027_vm14 = vcmp.eq.s32.totalorder %v3653_v32, 3  ;;  %vm1273_vm4 = vcmp.eq.s32.totalorder %v3653_v32, 4 }
0x1478   :  { %2946 = vtanh.f32 %v1911_v39  ;;  %v1905_v12 = vpop.f32.mrb[14].mxu1  ;;  %v2357_v63 = vmul.f32 -1.442695, %v1911_v39 }
0x1479   :  { %v1912_v61 = vadd.f32 %v1905_v12, %v1825_v18  ;;  %v1907_v2 = vpop.f32.mrb[15].mxu1  ;;  %v3664_v18 = vsub.s32 7, %v3653_v32 }
0x147a   :  { %v1913_v49 = vadd.f32 %v1907_v2, %v1826_v13  ;;  %v2289_v2 = vsel %vm287_vm2, 1.0, %v3102_v0  ;;  %vm1026_vm2 = vcmp.eq.s32.totalorder %v3645_v28, 3 }
0x147b   :  { %2948 = vtanh.f32 %v1912_v61  ;;  %v2356_v6 = vmul.f32 -1.442695, %v1912_v61  ;;  %vm541_vm7 = vcmp.eq.s32.totalorder %v3664_v18, 1  ;;  %vm294_vm9 = vcmp.eq.s32.totalorder %v3664_v18, 0 }
0x147c   :  { %2950 = vtanh.f32 %v1913_v49  ;;  %v2358_v36 = vmul.f32 -1.442695, %v1913_v49  ;;  %v2291_v49 = vsel %vm293_vm3, 1.0, %v3102_v0  ;;  %vm787_vm11 = vcmp.eq.s32.totalorder %v3664_v18, 2 }
0x147d   :  { %2952 = vpow2.f32 %v2355_v1  ;;  %vm1033_vm15 = vcmp.eq.s32.totalorder %v3664_v18, 3  ;;  %vm1032_vm3 = vcmp.eq.s32.totalorder %v3648_v30, 3 }
0x147e   :  { %2954 = vpow2.f32 %v2357_v63  ;;  %v2639_v63 = vpack.i.bf16 %v2291_v49, %v2289_v2  ;;  %v2319_v2 = vsel %vm1026_vm2, 1.0, %v3102_v0  ;;  %v2321_v49 = vsel %vm1032_vm3, 1.0, %v3102_v0 }
0x147f   :  { %2956 = vpow2.f32 %v2356_v6  ;;  %vm2011_vm2 = vcmp.eq.s32.totalorder %v3653_v32, 7  ;;  %vm2017_vm3 = vcmp.eq.s32.totalorder %v3664_v18, 7 }
0x1480   :  { %2958 = vpow2.f32 %v2358_v36  ;;  %v2300_v36 = vsel %vm535_vm6, 1.0, %v3102_v0  ;;  %vm1272_vm6 = vcmp.eq.s32.totalorder %v3645_v28, 4 }
0x1481   :  { %v2945_v56 = vpop.eup %2944 }
0x1482   :  { %v2947_v8 = vpop.eup %2946  ;;  %1946 = vrot.lane.b32.xlu0 %v2945_v56, %s3103_s5 }
0x1483   :  { %1968 = vrot.lane.b32.xlu1 %v2947_v8, %s3103_s5 }
0x1485   :  { %v2949_v58 = vpop.eup %2948 }
0x1486   :  { %v2951_v62 = vpop.eup %2950  ;;  %1948 = vrot.lane.b32.xlu0 %v2949_v58, %s3103_s5 }
0x1487   :  { %1970 = vrot.lane.b32.xlu1 %v2951_v62, %s3103_s5  ;;  %v2953_v15 = vpop.eup %2952  ;;  %v2301_v62 = vsel %vm540_vm5, 1.0, %v3102_v0  ;;  %vm1279_vm5 = vcmp.eq.s32.totalorder %v3664_v18, 4 }
0x1488   :  { %v2955_v38 = vpop.eup %2954  ;;  %v1920_v26 = vadd.f32 1.0, %v2953_v15  ;;  %v2645_v6 = vpack.i.bf16 %v2301_v62, %v2299_v4  ;;  %v2302_v15 = vsel %vm541_vm7, 1.0, %v3102_v0  ;;  %vm1278_vm7 = vcmp.eq.s32.totalorder %v3648_v30, 4 }
0x1489   :  { %v2957_v34 = vpop.eup %2956  ;;  %v1934_v35 = vadd.f32 1.0, %v2955_v38  ;;  %v2290_v38 = vsel %vm288_vm8, 1.0, %v3102_v0  ;;  %v2332_v62 = vsel %vm1279_vm5, 1.0, %v3102_v0  ;;  %vm1519_vm8 = vcmp.eq.s32.totalorder %v3653_v32, 5 }
0x148a   :  { %v2959_v42 = vpop.eup %2958  ;;  %2960 = vrcp.f32 %v1920_v26  ;;  %v1921_v43 = vadd.f32 1.0, %v2957_v34  ;;  %v2292_v26 = vsel %vm294_vm9, 1.0, %v3102_v0  ;;  %v2655_v34 = vpack.i.bf16 %v2302_v15, %v2300_v36 }
0x148b   :  { %2962 = vrcp.f32 %v1934_v35  ;;  %v1935_v17 = vadd.f32 1.0, %v2959_v42  ;;  %v2650_v35 = vpack.i.bf16 %v2292_v26, %v2290_v38  ;;  %v2310_v42 = vsel %vm781_vm10, 1.0, %v3102_v0 }
0x148c   :  { %2964 = vrcp.f32 %v1921_v43  ;;  %v2312_v43 = vsel %vm787_vm11, 1.0, %v3102_v0  ;;  %vm1525_vm9 = vcmp.eq.s32.totalorder %v3664_v18, 5  ;;  %vm1518_vm10 = vcmp.eq.s32.totalorder %v3645_v28, 5 }
0x148d   :  { %2966 = vrcp.f32 %v1935_v17  ;;  %v2309_v17 = vsel %vm780_vm12, 1.0, %v3102_v0  ;;  %vm1524_vm11 = vcmp.eq.s32.totalorder %v3648_v30, 5  ;;  %v2340_v15 = vsel %vm1519_vm8, 1.0, %v3102_v0 }
0x148e   :  { %v2342_v38 = vsel %vm1525_vm9, 1.0, %v3102_v0  ;;  %v2339_v26 = vsel %vm1518_vm10, 1.0, %v3102_v0  ;;  %vm1765_vm12 = vcmp.eq.s32.totalorder %v3653_v32, 6  ;;  %vm2016_vm5 = vcmp.eq.s32.totalorder %v3648_v30, 7 }
0x1494   :  { %v3655_v40 = vpop.eup %2960 }
0x1495   :  { %v3658_v37 = vpop.eup %2962 }
0x1496   :  { %v3669_v12 = vpop.eup %2964 }
0x1497   :  { %v3675_v56 = vpop.eup %2966 }
0x14f4   :  { %v1947_v5 = vpop.permute.xlu0 %1946 }
0x14f5   :  { %v1952_v45 = vmul.f32 %v3655_v40, %v1947_v5  ;;  %v1969_v39 = vpop.permute.xlu1 %1968  ;;  %v2311_v5 = vsel %vm786_vm13, 1.0, %v3102_v0  ;;  %vm1771_vm13 = vcmp.eq.s32.totalorder %v3664_v18, 6 }
0x14f6   :  { %v1974_v13 = vmul.f32 %v3658_v37, %v1969_v39  ;;  %v2660_v39 = vpack.i.bf16 %v2311_v5, %v2309_v17  ;;  %v2352_v17 = vsel %vm1771_vm13, 1.0, %v3102_v0 }
0x14f7   :  { %1956 = vrot.lane.b32.xlu0 %v1952_v45, %s3104_s26  ;;  %v2665_v45 = vpack.i.bf16 %v2312_v43, %v2310_v42  ;;  %v2350_v43 = vsel %vm1765_vm12, 1.0, %v3102_v0 }
0x14f8   :  { %v1949_v61 = vpop.permute.xlu0 %1948  ;;  %1978 = vrot.lane.b32.xlu1 %v1974_v13, %s3104_s26  ;;  %v2320_v13 = vsel %vm1027_vm14, 1.0, %v3102_v0  ;;  %vm1764_vm14 = vcmp.eq.s32.totalorder %v3645_v28, 6 }
0x14f9   :  { %v1953_v8 = vmul.f32 %v3669_v12, %v1949_v61  ;;  %v1971_v58 = vpop.permute.xlu1 %1970  ;;  %v2322_v61 = vsel %vm1033_vm15, 1.0, %v3102_v0  ;;  %vm1770_vm15 = vcmp.eq.s32.totalorder %v3648_v30, 6  ;;  %v2349_v5 = vsel %vm1764_vm14, 1.0, %v3102_v0 }
0x14fa   :  { %v1975_v1 = vmul.f32 %v3675_v56, %v1971_v58  ;;  %v2675_v4 = vpack.i.bf16 %v2322_v61, %v2320_v13  ;;  %v2330_v58 = vsel %vm1273_vm4, 1.0, %v3102_v0  ;;  %vm2010_vm4 = vcmp.eq.s32.totalorder %v3645_v28, 7 }
0x14fb   :  { %1958 = vrot.lane.b32.xlu0 %v1953_v8, %s3104_s26  ;;  %v2670_v8 = vpack.i.bf16 %v2321_v49, %v2319_v2  ;;  %v2360_v61 = vsel %vm2011_vm2, 1.0, %v3102_v0  ;;  %v2362_v2 = vsel %vm2017_vm3, 1.0, %v3102_v0  ;;  %v2359_v49 = vsel %vm2010_vm4, 1.0, %v3102_v0 }
0x14fc   :  { %1980 = vrot.lane.b32.xlu1 %v1975_v1, %s3104_s26  ;;  %v2329_v1 = vsel %vm1272_vm6, 1.0, %v3102_v0  ;;  %v2715_v32 = vpack.i.bf16 %v2362_v2, %v2360_v61  ;;  %v1942_v28 = vmul.f32 %v3655_v40, %v3599_v3  ;;  %v2068_v3 = vld [vmem:[#allocation7] sm:$0xff] }
0x14ff   :  { %2640 = vperm.xlu0 %2638, %v2639_v63   ;;  %v2331_v63 = vsel %vm1278_vm7, 1.0, %v3102_v0 }
0x1500   :  { %2646 = vperm.xlu1 %2644, %v2645_v6   ;;  %v2685_v6 = vpack.i.bf16 %v2332_v62, %v2330_v58  ;;  %v2680_v36 = vpack.i.bf16 %v2331_v63, %v2329_v1 }
0x1503   :  { %2656 = vperm.xlu0 %2638, %v2655_v34   ;;  %v2341_v34 = vsel %vm1524_vm11, 1.0, %v3102_v0 }
0x1504   :  { %2651 = vperm.xlu1 %2644, %v2650_v35   ;;  %v2695_v35 = vpack.i.bf16 %v2342_v38, %v2340_v15  ;;  %v2690_v42 = vpack.i.bf16 %v2341_v34, %v2339_v26  ;;  %v2069_v26 = vld [vmem:[#allocation7 + $0x8] sm:$0xff] }
0x1507   :  { %2666 = vperm.xlu0 %2638, %v2665_v45   ;;  %v2351_v45 = vsel %vm1770_vm15, 1.0, %v3102_v0 }
0x1508   :  { %2661 = vperm.xlu1 %2644, %v2660_v39   ;;  %v2705_v39 = vpack.i.bf16 %v2352_v17, %v2350_v43  ;;  %v2700_v13 = vpack.i.bf16 %v2351_v45, %v2349_v5  ;;  %v2072_v17 = vld [vmem:[#allocation7 + $0x20] sm:$0xff]  ;;  %v2073_v5 = vld [vmem:[#allocation7 + $0x28] sm:$0xff] }
0x1509   :  { %v2585_v45 = vpack.c.bf16 %v2073_v5, %v2072_v17 }
0x150b   :  { %2676 = vperm.xlu0 %2638, %v2675_v4   ;;  %v2361_v4 = vsel %vm2016_vm5, 1.0, %v3102_v0  ;;  %v1943_v0 = vmul.f32 %v3669_v12, %v3607_v60 }
0x150c   :  { %2671 = vperm.xlu1 %2644, %v2670_v8   ;;  %v2710_v18 = vpack.i.bf16 %v2361_v4, %v2359_v49  ;;  %v1964_v8 = vmul.f32 %v3658_v37, %v3601_v54  ;;  %v2070_v54 = vld [vmem:[#allocation7 + $0x10] sm:$0xff] }
0x150f   :  { %2686 = vperm.xlu0 %2638, %v2685_v6   ;;  %v1965_v6 = vmul.f32 %v3675_v56, %v3609_v9 }
0x1510   :  { %2681 = vperm.xlu1 %2644, %v2680_v36  }
0x1513   :  { %2696 = vperm.xlu0 %2638, %v2695_v35   ;;  %v2577_v35 = vpack.c.bf16 %v2069_v26, %v2068_v3 }
0x1514   :  { %2691 = vperm.xlu1 %2644, %v2690_v42   ;;  %v2071_v42 = vld [vmem:[#allocation7 + $0x18] sm:$0xff] }
0x1515   :  { %v2581_v60 = vpack.c.bf16 %v2071_v42, %v2070_v54  ;;  %2578 = vmatprep.subr.bf16.mxu0 %v2577_v35 }
0x1516   :  { %2580 = vmatpush3.bf16.msra.mxu0 %v2577_v35 }
0x1517   :  { %2706 = vperm.xlu0 %2638, %v2705_v39   ;;  %2582 = vmatprep.subr.bf16.mxu0 %v2581_v60 }
0x1518   :  { %2701 = vperm.xlu1 %2644, %v2700_v13  }
0x151a   :  { %2584 = vmatpush3.bf16.msra.mxu0 %v2581_v60 }
0x151b   :  { %2716 = vperm.xlu0 %2638, %v2715_v32   ;;  %2586 = vmatprep.subr.bf16.mxu0 %v2585_v45 }
0x151c   :  { %2711 = vperm.xlu1 %2644, %v2710_v18  }
0x151e   :  { %2588 = vmatpush3.bf16.msra.mxu0 %v2585_v45 }
0x1569   :  { %v1957_v30 = vpop.permute.xlu0 %1956 }
0x156a   :  { %v1962_v58 = vadd.f32 %v1957_v30, %v1942_v28  ;;  %v1979_v62 = vpop.permute.xlu1 %1978 }
0x156b   :  { %v1984_v1 = vadd.f32 %v1979_v62, %v1964_v8 }
0x156c   :  { %2968 = vtanh.f32 %v1962_v58 }
0x156d   :  { %2970 = vtanh.f32 %v1984_v1  ;;  %v1959_v63 = vpop.permute.xlu0 %1958 }
0x156e   :  { %v1963_v36 = vadd.f32 %v1959_v63, %v1943_v0  ;;  %v1981_v15 = vpop.permute.xlu1 %1980 }
0x156f   :  { %v1985_v38 = vadd.f32 %v1981_v15, %v1965_v6 }
0x1570   :  { %2972 = vtanh.f32 %v1963_v36 }
0x1571   :  { %2974 = vtanh.f32 %v1985_v38 }
0x1576   :  { %v2969_v34 = vpop.eup %2968 }
0x1577   :  { %v2971_v43 = vpop.eup %2970  ;;  %1990 = vrot.lane.b32.xlu1 %v2969_v34, %s3103_s5 }
0x1578   :  { %2002 = vrot.lane.b32.xlu0 %v2971_v43, %s3103_s5 }
0x157a   :  { %v2973_v9 = vpop.eup %2972 }
0x157b   :  { %v2975_v39 = vpop.eup %2974  ;;  %1992 = vrot.lane.b32.xlu1 %v2973_v9, %s3103_s5 }
0x157c   :  { %2004 = vrot.lane.b32.xlu0 %v2975_v39, %s3103_s5 }
0x157e   :  { %v2641_v61 = vpop.permute.xlu0 %2640 }
0x157f   :  { %v2647_v13 = vpop.permute.xlu1 %2646  ;;  %v2643_v63 = vunpack.i.h.bf16 %v2641_v61  ;;  %v2642_v6 = vunpack.i.l.bf16 %v2641_v61 }
0x1580   :  { %v2649_v36 = vunpack.i.h.bf16 %v2647_v13  ;;  %v2648_v15 = vunpack.i.l.bf16 %v2647_v13 }
0x1581   :  { %v323_v43 = vmul.f32 %v2643_v63, %v3286_v31  ;;  %v309_v60 = vmul.f32 %v2642_v6, %v3280_v27 }
0x1582   :  { %v2657_v49 = vpop.permute.xlu0 %2656  ;;  %v556_v17 = vmul.f32 %v2648_v15, %v3338_v46  ;;  %v570_v9 = vmul.f32 %v2649_v36, %v3340_v48  ;;  %v2074_v36 = vld [vmem:[#allocation7 + $0x30] sm:$0xff]  ;;  %v2075_v15 = vld [vmem:[#allocation7 + $0x38] sm:$0xff] }
0x1583   :  { %v2652_v2 = vpop.permute.xlu1 %2651  ;;  %v2659_v30 = vunpack.i.h.bf16 %v2657_v49  ;;  %v2658_v8 = vunpack.i.l.bf16 %v2657_v49 }
0x1584   :  { %v2654_v58 = vunpack.i.h.bf16 %v2652_v2  ;;  %v2653_v62 = vunpack.i.l.bf16 %v2652_v2  ;;  %v558_v27 = vadd.f32 %v556_v17, %v309_v60 }
0x1585   :  { %v571_v38 = vmul.f32 %v2659_v30, %v3348_v52  ;;  %v557_v3 = vmul.f32 %v2658_v8, %v3346_v50 }
0x1586   :  { %v2667_v32 = vpop.permute.xlu0 %2666  ;;  %v324_v26 = vmul.f32 %v2654_v58, %v3292_v33  ;;  %v310_v54 = vmul.f32 %v2653_v62, %v3284_v29 }
0x1587   :  { %v2662_v4 = vpop.permute.xlu1 %2661  ;;  %v2669_v34 = vunpack.i.h.bf16 %v2667_v32  ;;  %v2668_v35 = vunpack.i.l.bf16 %v2667_v32  ;;  %v572_v32 = vadd.f32 %v570_v9, %v323_v43 }
0x1588   :  { %v2663_v42 = vunpack.i.l.bf16 %v2662_v4  ;;  %v559_v45 = vadd.f32 %v557_v3, %v310_v54  ;;  %v573_v52 = vadd.f32 %v571_v38, %v324_v26  ;;  %v2664_v39 = vunpack.i.h.bf16 %v2662_v4 }
0x1589   :  { %v817_v33 = vmul.f32 %v2669_v34, %v3406_v23  ;;  %v803_v29 = vmul.f32 %v2668_v35, %v3404_v19  ;;  %v2589_v3 = vpack.c.bf16 %v2075_v15, %v2074_v36 }
0x158a   :  { %v2677_v28 = vpop.permute.xlu0 %2676  ;;  %v802_v13 = vmul.f32 %v2663_v42, %v3396_v10  ;;  %v816_v48 = vmul.f32 %v2664_v39, %v3398_v16 }
0x158b   :  { %v2672_v18 = vpop.permute.xlu1 %2671  ;;  %v2678_v61 = vunpack.i.l.bf16 %v2677_v28  ;;  %v2679_v2 = vunpack.i.h.bf16 %v2677_v28  ;;  %v805_v4 = vadd.f32 %v803_v29, %v559_v45  ;;  %v819_v58 = vadd.f32 %v817_v33, %v573_v52  ;;  %2590 = vmatprep.subr.bf16.mxu0 %v2589_v3 }
0x158c   :  { %v2674_v31 = vunpack.i.h.bf16 %v2672_v18  ;;  %v2673_v49 = vunpack.i.l.bf16 %v2672_v18  ;;  %v804_v62 = vadd.f32 %v802_v13, %v558_v27  ;;  %v818_v26 = vadd.f32 %v816_v48, %v572_v32  ;;  %2592 = vmatpush3.bf16.msra.mxu0 %v2589_v3  ;;  %v2169_v32 = vld [vmem:[#allocation8 + $0x18] sm:$0xff] }
0x158d   :  { %v1049_v23 = vmul.f32 %v2678_v61, %v3462_v55  ;;  %v1063_v10 = vmul.f32 %v2679_v2, %v3464_v57  ;;  %v2166_v61 = vld [vmem:[#allocation8] sm:$0xff]  ;;  %v2167_v2 = vld [vmem:[#allocation8 + $0x8] sm:$0xff]  ;;  %v2173_v3 = vld [vmem:[#allocation8 + $0x38] sm:$0xff] }
0x158e   :  { %v3750_v0 = vpop.permute.xlu0 %2686  ;;  %v1062_v28 = vmul.f32 %v2674_v31, %v3456_v53  ;;  %v1048_v18 = vmul.f32 %v2673_v49, %v3454_v51  ;;  %v2168_v31 = vld [vmem:[#allocation8 + $0x10] sm:$0xff] }
0x158f   :  { %v2682_v1 = vpop.permute.xlu1 %2681  ;;  %v2688_v46 = vunpack.i.l.bf16 %v3750_v0  ;;  %v2689_v16 = vunpack.i.h.bf16 %v3750_v0  ;;  %v1051_v34 = vadd.f32 %v1049_v23, %v805_v4 }
0x1590   :  { %v2684_v30 = vunpack.i.h.bf16 %v2682_v1  ;;  %v2683_v8 = vunpack.i.l.bf16 %v2682_v1  ;;  %v1050_v43 = vadd.f32 %v1048_v18, %v804_v62  ;;  %v1064_v60 = vadd.f32 %v1062_v28, %v818_v26 }
0x1591   :  { %v1295_v1 = vmul.f32 %v2688_v46, %v3519_v59  ;;  %v1065_v59 = vadd.f32 %v1063_v10, %v819_v58  ;;  %v2593_v46 = vpack.c.bf16 %v2167_v2, %v2166_v61 }
0x1592   :  { %v2697_v50 = vpop.permute.xlu0 %2696  ;;  %v1308_v55 = vmul.f32 %v2684_v30, %v3513_v44  ;;  %v1294_v54 = vmul.f32 %v2683_v8, %v3511_v41  ;;  %v2597_v30 = vpack.c.bf16 %v2169_v32, %v2168_v31  ;;  %v2171_v8 = vld [vmem:[#allocation8 + $0x28] sm:$0xff] }
0x1593   :  { %v2692_v5 = vpop.permute.xlu1 %2691  ;;  %v2699_v53 = vunpack.i.h.bf16 %v2697_v50  ;;  %v2698_v35 = vunpack.i.l.bf16 %v2697_v50  ;;  %v1297_v9 = vadd.f32 %v1295_v1, %v1051_v34  ;;  %2594 = vmatprep.subr.bf16.mxu1 %v2593_v46 }
0x1594   :  { %v2693_v63 = vunpack.i.l.bf16 %v2692_v5  ;;  %v2694_v38 = vunpack.i.h.bf16 %v2692_v5  ;;  %v1309_v5 = vmul.f32 %v2689_v16, %v3521_v47  ;;  %v1296_v41 = vadd.f32 %v1294_v54, %v1050_v43  ;;  %2596 = vmatpush3.bf16.msra.mxu1 %v2593_v46 }
0x1595   :  { %v1310_v45 = vadd.f32 %v1308_v55, %v1064_v60  ;;  %v1555_v50 = vmul.f32 %v2699_v53, %v3578_v25  ;;  %v1541_v33 = vmul.f32 %v2698_v35, %v3576_v11  ;;  %v2170_v11 = vld [vmem:[#allocation8 + $0x20] sm:$0xff]  ;;  %2598 = vmatprep.subr.bf16.mxu1 %v2597_v30  ;;  %v2175_v35 = vld [vmem:[#allocation8 + $0x48] sm:$0xff] }
0x1596   :  { %v2707_v6 = vpop.permute.xlu0 %2706  ;;  %v1540_v0 = vmul.f32 %v2693_v63, %v3568_v24  ;;  %v1554_v44 = vmul.f32 %v2694_v38, %v3570_v7  ;;  %v1311_v4 = vadd.f32 %v1309_v5, %v1065_v59  ;;  %v2601_v36 = vpack.c.bf16 %v2171_v8, %v2170_v11  ;;  %v2172_v38 = vld [vmem:[#allocation8 + $0x30] sm:$0xff]  ;;  %v2174_v53 = vld [vmem:[#allocation8 + $0x40] sm:$0xff] }
0x1597   :  { %v2702_v19 = vpop.permute.xlu1 %2701  ;;  %v2708_v52 = vunpack.i.l.bf16 %v2707_v6  ;;  %v2709_v29 = vunpack.i.h.bf16 %v2707_v6  ;;  %v1543_v23 = vadd.f32 %v1541_v33, %v1297_v9  ;;  %v2178_v60 = vld [vmem:[#allocation8 + $0x60] sm:$0xff] }
0x1598   :  { %v2703_v57 = vunpack.i.l.bf16 %v2702_v19  ;;  %v2704_v51 = vunpack.i.h.bf16 %v2702_v19  ;;  %v1542_v47 = vadd.f32 %v1540_v0, %v1296_v41  ;;  %v1556_v48 = vadd.f32 %v1554_v44, %v1310_v45  ;;  %2600 = vmatpush3.bf16.msra.mxu1 %v2597_v30  ;;  %v2179_v0 = vld [vmem:[#allocation8 + $0x68] sm:$0xff]  ;;  %v2363_v33 = vld [vmem:[%s3819_s4] ss:$0 sm:$0xff]  ;;  %s3064_s4 = scalar_lea.vmem %s2272_s15, 256 }
0x1599   :  { %v1801_v19 = vmul.f32 %v2709_v29, %v3627_v21  ;;  %v1557_v15 = vadd.f32 %v1555_v50, %v1311_v4  ;;  %2602 = vmatprep.subr.bf16.mxu1 %v2601_v36  ;;  %p3065_p4 = scmp.ne.s32.totalorder %s2272_s15, %s3064_s4  ;;  %p3070_p6 = scmp.lt.s32.totalorder %s3064_s4, %s3064_s4 }
0x159a   :  { %v2717_v17 = vpop.permute.xlu0 %2716  ;;  %v1786_v39 = vmul.f32 %v2703_v57, %v3617_v14  ;;  %v1800_v24 = vmul.f32 %v2704_v51, %v3619_v22  ;;  %v1787_v22 = vmul.f32 %v2708_v52, %v3625_v20  ;;  %v2605_v57 = vpack.c.bf16 %v2173_v3, %v2172_v38  ;;  %v2176_v51 = vld [vmem:[#allocation8 + $0x50] sm:$0xff] }
0x159b   :  { %v2712_v42 = vpop.permute.xlu1 %2711  ;;  %v2718_v18 = vunpack.i.l.bf16 %v2717_v17  ;;  %v2719_v16 = vunpack.i.h.bf16 %v2717_v17  ;;  %v1803_v55 = vadd.f32 %v1801_v19, %v1557_v15  ;;  %v2617_v17 = vpack.c.bf16 %v2179_v0, %v2178_v60  ;;  %v2180_v52 = vld [vmem:[#allocation8 + $0x70] sm:$0xff]  ;;  %p3071_p7 = por %p3070_p6, %p3069_p5 }
0x159c   :  { %v2713_v49 = vunpack.i.l.bf16 %v2712_v42  ;;  %v2714_v14 = vunpack.i.h.bf16 %v2712_v42  ;;  %v1788_v58 = vadd.f32 %v1786_v39, %v1542_v47  ;;  %v1789_v26 = vadd.f32 %v1787_v22, %v1543_v23  ;;  %2604 = vmatpush3.bf16.msra.mxu1 %v2601_v36  ;;  %v2177_v42 = vld [vmem:[#allocation8 + $0x58] sm:$0xff]  ;;  %v2366_v47 = vld [vmem:[%s3821_s6] ss:$0 sm:$0xff] }
0x159d   :  { %2606 = vmatprep.subr.bf16.mxu1 %v2605_v57  ;;  %v2613_v43 = vpack.c.bf16 %v2177_v42, %v2176_v51  ;;  %v2181_v39 = vld [vmem:[#allocation8 + $0x78] sm:$0xff]  ;;  %p3072_p8 = pnand %p3071_p7, %p3065_p4 }
0x159e   :  { %v2621_v50 = vpack.c.bf16 %v2181_v39, %v2180_v52 }
0x15a0   :  { %2608 = vmatpush3.bf16.msra.mxu1 %v2605_v57 }
0x15e9   :  { %v1991_v13 = vpop.permute.xlu1 %1990 }
0x15ea   :  { %v1996_v7 = vmul.f32 %v3655_v40, %v1991_v13  ;;  %v2003_v27 = vpop.permute.xlu0 %2002  ;;  %v1802_v40 = vadd.f32 %v1800_v24, %v1556_v48 }
0x15eb   :  { %v2008_v25 = vmul.f32 %v3658_v37, %v2003_v27 }
0x15ec   :  { %v2032_v62 = vmul.f32 %v2713_v49, %v1996_v7 }
0x15ed   :  { %v2046_v10 = vmul.f32 %v2714_v14, %v2008_v25  ;;  %v1993_v28 = vpop.permute.xlu1 %1992 }
0x15ee   :  { %v2034_v63 = vadd.f32 %v2032_v62, %v1788_v58  ;;  %v1997_v37 = vmul.f32 %v3669_v12, %v1993_v28  ;;  %v2005_v6 = vpop.permute.xlu0 %2004 }
0x15ef   :  { %v2048_v20 = vadd.f32 %v2046_v10, %v1802_v40  ;;  %v2009_v1 = vmul.f32 %v3675_v56, %v2005_v6  ;;  %v2609_v56 = vpack.c.bf16 %v2175_v35, %v2174_v53 }
0x15f0   :  { %v2033_v21 = vmul.f32 %v2718_v18, %v1997_v37  ;;  %2052 = vrot.lane.b32.xlu1 %v2034_v63, %s3104_s26 }
0x15f1   :  { %v2047_v54 = vmul.f32 %v2719_v16, %v2009_v1  ;;  %2060 = vrot.lane.b32.xlu0 %v2048_v20, %s3103_s5  ;;  %2610 = vmatprep.subr.bf16.mxu1 %v2609_v56 }
0x15f2   :  { %v2035_v12 = vadd.f32 %v2033_v21, %v1789_v26  ;;  %2612 = vmatpush3.bf16.msra.mxu1 %v2609_v56 }
0x15f3   :  { %v2049_v34 = vadd.f32 %v2047_v54, %v1803_v55  ;;  %2614 = vmatprep.subr.bf16.mxu1 %v2613_v43 }
0x15f4   :  { %2054 = vrot.lane.b32.xlu1 %v2035_v12, %s3104_s26 }
0x15f5   :  { %2062 = vrot.lane.b32.xlu0 %v2049_v34, %s3103_s5 }
0x15f6   :  { %2616 = vmatpush3.bf16.msra.mxu1 %v2613_v43 }
0x15f7   :  { %2618 = vmatprep.subr.bf16.mxu1 %v2617_v17 }
0x15fa   :  { %2620 = vmatpush3.bf16.msra.mxu1 %v2617_v17 }
0x15fb   :  { %2622 = vmatprep.subr.bf16.mxu1 %v2621_v50 }
0x15fe   :  { %2624 = vmatpush3.bf16.msra.mxu1 %v2621_v50 }
0x1662   :  { %v2053_v59 = vpop.permute.xlu1 %2052 }
0x1663   :  { %v2061_v5 = vpop.permute.xlu0 %2060 }
0x1664   :  { %v2066_v9 = vsel %vm343_vm0, %v2053_v59, %v2061_v5 }
0x1665   :  { %2411 = vmatprep.mubr.msk.f32.mxu0 %vm106_vm1, %v2066_v9 }
0x1666   :  { %v2055_v44 = vpop.permute.xlu1 %2054 }
0x1667   :  { %v2063_v41 = vpop.permute.xlu0 %2062 }
0x1668   :  { %v2067_v45 = vsel %vm343_vm0, %v2055_v44, %v2063_v41 }
0x1669   :  { %2412 = vmatmul.mubr.msk.f32.vlgmr.msra.gmra.mrb[16].mxu0 %vm106_vm1, %v2067_v45 }
0x173c   :  { %v2413_v29 = vpop.f32.mrb[16].mxu0 }
0x173d   :  { %v2161_v24 = vadd.f32 %v2413_v29, %v2363_v33  ;;  %v2155_v13 = vpop.f32.mrb[17].mxu0 }
0x173e   :  { %v2156_v61 = vadd.f32 %v2363_v33, %v2155_v13 }
0x173f   :  { %v2165_v31 = vmax.f32 %v2161_v24, 0.0 }
0x1740   :  { %v2164_v2 = vmax.f32 %v2156_v61, 0.0 }
0x1742   :  { %2446 = vmatprep.mubr.f32.mxu1 %v2164_v2 }
0x1743   :  { %2447 = vmatmul.mubr.f32.vlgmr.msra.gmra.mrb[16].mxu1 %v2165_v31 }
0x1816   :  { %v2448_v49 = vpop.f32.mrb[16].mxu1 }
0x1817   :  { %v2261_v7 = vadd.f32 %v2448_v49, %v2366_v47  ;;  %v2255_v27 = vpop.f32.mrb[17].mxu1 }
0x1818   :  { %v2256_v46 = vadd.f32 %v2366_v47, %v2255_v27 }
0x1819   :  { %2265 = vst [vmem:[#allocation10 + $0x8] sm:$0xff] %v2261_v7 }
0x181a   :  { %2264 = vst [vmem:[#allocation10] sm:$0xff] %v2256_v46 }
0x181b   :  { %3075 = shalt.err (!%p3072_p8)
}
0x181c   :  { %s3076_s6 = scalar_lea.hbm %s3822_s7, 256 }
0x181d   :  { %p3077_p9 = scmp.ne.s32.totalorder %s3822_s7, %s3076_s6  ;;  %p3080_p10 = scmp.lt.u32.totalorder %s3076_s6, %s3822_s7 }
0x181f   :  { %p3082_p11 = pnand %p3080_p10, %p3077_p9 }
0x1821   :  { %3085 = shalt.err (!%p3082_p11)
}
0x1822   :  { %2277 = dma.vmem_to_hbm [thread:$0]  %s2272_s15, 256, %s3822_s7, [#allocation4], %s3099_s0, %s3099_s0, %s3100_s27  }
0x1823   :  { %3092 = dma.done.wait [#allocation4], 256  }
0x1824   :  { %3093 = vsyncadd [#allocation4], 4294967040 }
0x1825   :  { %2281 = vsyncpa [#allocation3], 1 }
0x1826   :  { %2282 = vsyncpa [#allocation6], 1 }
0x1827   :  { %2283 = vsyncpa [#allocation9], 1 }
0x1828   :  { %2284 = vsyncpa [#allocation4], 1 }

</bundles_post_ra>
